<compile_context>
chip_gen: v6e
topology: v6e:2x2x1
jax: 0.10.0
libtpu: 0.0.40
codegen_flags: <defaults>
</compile_context>

<pallas_src>
import functools
import math

import jax
import jax.numpy as jnp
from jax.experimental import pallas as pl
from jax.experimental.pallas import tpu as pltpu

_EPS = 1e-5


# ---------------------------------------------------------------------------
# Kernels
# ---------------------------------------------------------------------------
def _ln_packed_kernel(x_ref, w_ref, m_ref, o_ref, *, c):
    """Lane-dense path: each kernel row packs g = width/c logical rows.

    x_ref: (block_rows, width) with width = g*c a multiple of 128.
    w_ref: (1, width)  -- weight tiled g times.
    m_ref: (width, width) block-diagonal ones; x @ m = per-segment sum broadcast
           back across all lanes of the segment (runs on the otherwise idle MXU).
    """
    x = x_ref[...].astype(jnp.float32)
    w = w_ref[...].astype(jnp.float32)
    m = m_ref[...]
    inv_c = jnp.float32(1.0 / c)

    # Two-pass variance (numerically robust for non-zero-mean activations).
    seg_sum = jnp.dot(x, m, preferred_element_type=jnp.float32,
                      precision=jax.lax.Precision.HIGHEST)
    mean = seg_sum * inv_c
    d = x - mean
    seg_sq = jnp.dot(d * d, m, preferred_element_type=jnp.float32,
                     precision=jax.lax.Precision.HIGHEST)
    var = seg_sq * inv_c

    o_ref[...] = (x * jax.lax.rsqrt(var + jnp.float32(_EPS)) * w).astype(o_ref.dtype)


def _ln_rowwise_kernel(x_ref, w_ref, o_ref, *, c):
    """Fallback path: one logical row per kernel row (lane-dense iff C % 128 == 0)."""
    x = x_ref[...].astype(jnp.float32)
    w = w_ref[...].astype(jnp.float32)
    inv_c = jnp.float32(1.0 / c)

    mean = jnp.sum(x, axis=-1, keepdims=True) * inv_c
    d = x - mean
    var = jnp.sum(d * d, axis=-1, keepdims=True) * inv_c

    o_ref[...] = (x * jax.lax.rsqrt(var + jnp.float32(_EPS)) * w).astype(o_ref.dtype)


# ---------------------------------------------------------------------------
# Block sizing / chip budgets
# ---------------------------------------------------------------------------
def _cdiv(a, b):
    return (a + b - 1) // b


def _round8(n):
    return max(8, (n // 8) * 8)


def _chip_budgets():
    """Per-generation knobs derived from VMEM capacity (v7x: 64 MiB/TC, 2 TCs)."""
    vmem_cap = 128 << 20
    try:
        vmem_cap = int(getattr(pltpu.get_tpu_info(), "vmem_capacity_bytes", vmem_cap))
    except Exception:
        pass
    if vmem_cap <= (64 << 20):
        # v7x-like: faster HBM -> bigger real-traffic steps, tighter scoped cap,
        # even grid so dimension_semantics=("parallel",) splits evenly over 2 TCs.
        return {"target_hbm": 6 << 20, "scoped_cap": 28 << 20, "even_grid": True}
    # v5e / v6e: 128 MiB VMEM, single TensorCore.
    return {"target_hbm": 4 << 20, "scoped_cap": 64 << 20, "even_grid": False}


def _choose_block_rows(n_rows, width, dtype_bytes, budgets):
    """Pick block_rows from real HBM bytes per step, checked against scoped VMEM."""
    w_pad = _cdiv(width, 128) * 128
    row_hbm = width * dtype_bytes                      # actual HBM traffic per row (read)
    # VMEM per row: double-buffered input + output blocks (lane padded) plus ~4
    # block-sized f32 temporaries (f32 upcast, x - mean, d*d, scaled result).
    row_vmem = 4 * w_pad * dtype_bytes + 4 * w_pad * 4

    vmem_budget = budgets["scoped_cap"] - (4 << 20)
    br = budgets["target_hbm"] // max(1, row_hbm)
    br = min(br, vmem_budget // max(1, row_vmem))
    br = min(br, _cdiv(n_rows, 8) * 8)                 # no bigger than the problem
    br = _round8(br)

    if budgets["even_grid"]:
        steps = _cdiv(n_rows, br)
        if steps > 1 and steps % 2 == 1:
            alt = _round8(_cdiv(n_rows, steps + 1))
            if _cdiv(n_rows, alt) % 2 == 0:
                br = alt
    return br, row_vmem


# ---------------------------------------------------------------------------
# Wrapper
# ---------------------------------------------------------------------------
def biasfree_layernorm(x, weight, *, block_rows=None):
    """x: (..., C); weight: (C,). Returns x / sqrt(var(x,-1)+1e-5) * weight."""
    orig_shape = x.shape
    c = orig_shape[-1]
    assert weight.shape == (c,), "weight must have shape (C,)"

    x2 = x.reshape(-1, c)
    rows = x2.shape[0]
    if rows == 0:
        return x
    dtype_bytes = jnp.dtype(x.dtype).itemsize
    budgets = _chip_budgets()

    # Lane-dense packing factor: smallest g with (g*C) % 128 == 0.
    g = 128 // math.gcd(c, 128)
    packed = (g > 1) and (g * c <= 256) and (rows % g == 0)

    if packed:
        width = g * c
        n_rows = rows // g
        xk = x2.reshape(n_rows, width)                 # free row-major reshape
        wk = jnp.tile(weight.astype(x.dtype), g).reshape(1, width)
        seg = jnp.arange(width, dtype=jnp.int32) // c
        mmat = (seg[:, None] == seg[None, :]).astype(jnp.float32)
        kernel = functools.partial(_ln_packed_kernel, c=c)
    else:
        width = c
        n_rows = rows
        xk = x2
        wk = weight.astype(x.dtype).reshape(1, c)
        mmat = None
        kernel = functools.partial(_ln_rowwise_kernel, c=c)

    br, row_vmem = _choose_block_rows(n_rows, width, dtype_bytes, budgets)
    if block_rows is not None:
        br = min(_round8(block_rows), _cdiv(n_rows, 8) * 8)

    grid = (_cdiv(n_rows, br),)                        # partial last block, no host pad

    in_arrays = [xk, wk]
    in_specs = [
        pl.BlockSpec((br, width), lambda i: (i, 0)),
        pl.BlockSpec((1, width), lambda i: (0, 0)),
    ]
    extra_bytes = 1 << 20
    if packed:
        in_arrays.append(mmat)
        in_specs.append(pl.BlockSpec((width, width), lambda i: (0, 0)))
        extra_bytes += width * width * 4

    vmem_limit = int(min(budgets["scoped_cap"],
                         max(4 << 20, br * row_vmem + extra_bytes + (2 << 20))))

    out = pl.pallas_call(
        kernel,
        out_shape=jax.ShapeDtypeStruct((n_rows, width), x.dtype),
        grid_spec=pltpu.PrefetchScalarGridSpec(
            num_scalar_prefetch=0,
            grid=grid,
            in_specs=in_specs,
            out_specs=pl.BlockSpec((br, width), lambda i: (i, 0)),
        ),
        compiler_params=pltpu.CompilerParams(
            dimension_semantics=("parallel",),
            vmem_limit_bytes=vmem_limit,
        ),
    )(*in_arrays)

    return out.reshape(orig_shape)


# ---------------------------------------------------------------------------
# Reference + test
# ---------------------------------------------------------------------------
def _reference(x, weight):
    xf = x.astype(jnp.float32)
    var = jnp.var(xf, axis=-1, keepdims=True)          # unbiased=False
    return (xf / jnp.sqrt(var + _EPS) * weight.astype(jnp.float32)).astype(x.dtype)


if __name__ == "__main__":
    key = jax.random.PRNGKey(0)

    # Case 1: typical token layout (B, H*W, C) with small C -> packed lane-dense path.
    # Non-zero mean exercises the two-pass variance numerics.
    B, N, C = 2, 16 * 16, 32
    k1, k2, k3 = jax.random.split(key, 3)
    x = jax.random.normal(k1, (B, N, C), dtype=jnp.float32) * 0.5 + 3.0
    weight = jax.random.normal(k2, (C,), dtype=jnp.float32) * 0.1 + 1.0

    out = jax.block_until_ready(biasfree_layernorm(x, weight))
    ref = _reference(x, weight)
    assert jnp.allclose(out, ref, atol=1e-4, rtol=1e-5), "mismatch vs reference (case 1)"

    # Case 2: C=48 and row count not divisible by 8 -> row-wise fallback path with a
    # partial last block.
    B2, N2, C2 = 3, 50, 48
    x2 = jax.random.normal(k3, (B2, N2, C2), dtype=jnp.float32) + 1.5
    w2 = jax.random.normal(jax.random.PRNGKey(2), (C2,), dtype=jnp.float32)

    out2 = jax.block_until_ready(biasfree_layernorm(x2, w2))
    ref2 = _reference(x2, w2)
    assert jnp.allclose(out2, ref2, atol=1e-4, rtol=1e-5), "mismatch vs reference (case 2)"

    print("KERNEL_OK")
</pallas_src>

<mosaic_0001>
module attributes {stable_mosaic.version = 11 : i64} {
  func.func @_ln_packed_kernel(%arg0: i32, %arg1: memref<128x128xf32, #tpu.memory_space<vmem>>, %arg2: memref<1x128xf32, #tpu.memory_space<vmem>>, %arg3: memref<128x128xf32, #tpu.memory_space<vmem>>, %arg4: memref<128x128xf32, #tpu.memory_space<vmem>>) attributes {dimension_semantics = [#tpu.dimension_semantics<parallel>], iteration_bounds = array<i64: 1>, scalar_prefetch = 0 : i64, scratch_operands = 0 : i64, tpu.core_type = #tpu.core_type<tc>, window_params = [{transform_indices = @transform_0, window_bounds = array<i64: 128, 128>}, {pipeline_mode = #tpu.pipeline_mode<synchronous>, transform_indices = @transform_1, window_bounds = array<i64: 1, 128>}, {pipeline_mode = #tpu.pipeline_mode<synchronous>, transform_indices = @transform_2, window_bounds = array<i64: 128, 128>}, {transform_indices = @transform_3, window_bounds = array<i64: 128, 128>}]} {
    %c0 = arith.constant 0 : index
    %c0_0 = arith.constant 0 : index
    %0 = vector.load %arg1[%c0, %c0_0] : memref<128x128xf32, #tpu.memory_space<vmem>>, vector<128x128xf32>
    %c0_1 = arith.constant 0 : index
    %c0_2 = arith.constant 0 : index
    %1 = vector.load %arg2[%c0_1, %c0_2] : memref<1x128xf32, #tpu.memory_space<vmem>>, vector<1x128xf32>
    %c0_3 = arith.constant 0 : index
    %c0_4 = arith.constant 0 : index
    %2 = vector.load %arg3[%c0_3, %c0_4] : memref<128x128xf32, #tpu.memory_space<vmem>>, vector<128x128xf32>
    %cst = arith.constant dense<0.000000e+00> : vector<128x128xf32>
    %3 = tpu.matmul %0, %2, %cst {dimension_numbers = #tpu.dot_dimension_numbers<[1], [0], [0], [1], [0, 0, 1, 1], [], []>, precision = #tpu.contract_precision<fp32>} : vector<128x128xf32>, vector<128x128xf32>, vector<128x128xf32> -> vector<128x128xf32>
    %cst_5 = arith.constant 3.125000e-02 : f32
    %4 = vector.broadcast %cst_5 : f32 to vector<128x128xf32>
    %5 = arith.mulf %3, %4 : vector<128x128xf32>
    %6 = arith.subf %0, %5 : vector<128x128xf32>
    %7 = arith.mulf %6, %6 : vector<128x128xf32>
    %cst_6 = arith.constant dense<0.000000e+00> : vector<128x128xf32>
    %8 = tpu.matmul %7, %2, %cst_6 {dimension_numbers = #tpu.dot_dimension_numbers<[1], [0], [0], [1], [0, 0, 1, 1], [], []>, precision = #tpu.contract_precision<fp32>} : vector<128x128xf32>, vector<128x128xf32>, vector<128x128xf32> -> vector<128x128xf32>
    %cst_7 = arith.constant 3.125000e-02 : f32
    %9 = vector.broadcast %cst_7 : f32 to vector<128x128xf32>
    %10 = arith.mulf %8, %9 : vector<128x128xf32>
    %cst_8 = arith.constant 9.99999974E-6 : f32
    %11 = vector.broadcast %cst_8 : f32 to vector<128x128xf32>
    %12 = arith.addf %10, %11 : vector<128x128xf32>
    %13 = math.rsqrt %12 : vector<128x128xf32>
    %14 = arith.mulf %0, %13 : vector<128x128xf32>
    %15 = vector.broadcast %1 : vector<1x128xf32> to vector<128x128xf32>
    %16 = arith.mulf %14, %15 : vector<128x128xf32>
    %c0_9 = arith.constant 0 : index
    %c0_10 = arith.constant 0 : index
    %17 = vector.load %arg4[%c0_9, %c0_10] : memref<128x128xf32, #tpu.memory_space<vmem>>, vector<128x128xf32>
    tpu.vector_store %arg4[%c0_9, %c0_10], %16 {strides = array<i32>} : memref<128x128xf32, #tpu.memory_space<vmem>>, vector<128x128xf32>,
    return
  }
  func.func @transform_0(%arg0: i32) -> (i32, i32) {
    %c0_i32 = arith.constant 0 : i32
    %c0_i32_0 = arith.constant 0 : i32
    return %arg0, %c0_i32 : i32, i32
  }
  func.func @transform_1(%arg0: i32) -> (i32, i32) {
    %c0_i32 = arith.constant 0 : i32
    %c0_i32_0 = arith.constant 0 : i32
    %c0_i32_1 = arith.constant 0 : i32
    return %c0_i32, %c0_i32_0 : i32, i32
  }
  func.func @transform_2(%arg0: i32) -> (i32, i32) {
    %c0_i32 = arith.constant 0 : i32
    %c0_i32_0 = arith.constant 0 : i32
    %c0_i32_1 = arith.constant 0 : i32
    return %c0_i32, %c0_i32_0 : i32, i32
  }
  func.func @transform_3(%arg0: i32) -> (i32, i32) {
    %c0_i32 = arith.constant 0 : i32
    %c0_i32_0 = arith.constant 0 : i32
    return %arg0, %c0_i32 : i32, i32
  }
}

</mosaic_0001>

<bundles_post_ra>
// kernel: tpu_custom_call.1
= control target key start
LH: loop header
LB: loop body
LE: loop exit
PB: predicated region body
PF: predicated region fallthrough
CT: control target
= control target key end

     0   :  { %8 = vsyncpa [#allocation3], 0  ;;  %s5368_s0 = inlined_call_operand.hbm [shape: f32[128,128], index: 0, kind: input, shape index: {}]   ;;  %s5369_s1 = inlined_call_operand.vmem [shape: f32[1,128], index: 1, kind: input, shape index: {}]   ;;  %s5370_s2 = inlined_call_operand.hbm [shape: f32[128,128], index: 2, kind: input, shape index: {}]   ;;  %s5371_s3 = inlined_call_operand.hbm [shape: f32[128,128], index: 3, kind: output, shape index: {}]  }
   0x1   :  { %9 = vsyncpa [#allocation6], 0 }
   0x2   :  { %10 = vsyncpa [#allocation4], 0  ;;  %s4007_s12 = smov [#allocation2]  }
   0x3   :  { %s16_s13 = sshll.u32 %s4007_s12, 4  ;;  %s17_s13 = int_to_ptr.vmem [resolvable:$true] %s16_s13 }
   0x4   :  { %s3949_s14 = scalar_lea.vmem %s17_s13, 2048  ;;  %p3954_p1 = scmp.lt.s32.totalorder %s17_s13, %s17_s13 }
   0x5   :  { %p3950_p0 = scmp.ne.s32.totalorder %s17_s13, %s3949_s14  ;;  %p3955_p2 = scmp.lt.s32.totalorder %s3949_s14, %s3949_s14 }
   0x7   :  { %p3956_p3 = por %p3955_p2, %p3954_p1 }
   0x9   :  { %p3957_p4 = pnand %p3956_p3, %p3950_p0 }
   0xb   :  { %3960 = shalt.err (!%p3957_p4)
}
   0xc   :  { %s4008_s15 = smov 128   ;;  %s4009_s16 = smov 8  }
   0xd   :  { %22 = dma.hbm_to_vmem [thread:$0]  %s5368_s0, 2048, %s17_s13, [#allocation3], %s4008_s15, %s4008_s15, %s4009_s16  }
   0xe   :  { %s4010_s19 = smov [#allocation5]  }
   0xf   :  { %s30_s20 = sshll.u32 %s4010_s19, 4  ;;  %s31_s20 = int_to_ptr.vmem [resolvable:$true] %s30_s20 }
  0x10   :  { %s3969_s21 = scalar_lea.vmem %s31_s20, 2048  ;;  %p3974_p6 = scmp.lt.s32.totalorder %s31_s20, %s31_s20 }
  0x11   :  { %p3970_p5 = scmp.ne.s32.totalorder %s31_s20, %s3969_s21  ;;  %p3975_p7 = scmp.lt.s32.totalorder %s3969_s21, %s3969_s21 }
  0x13   :  { %p3976_p8 = por %p3975_p7, %p3974_p6 }
  0x15   :  { %p3977_p9 = pnand %p3976_p8, %p3970_p5 }
  0x17   :  { %3980 = shalt.err (!%p3977_p9)
}
  0x18   :  { %36 = dma.hbm_to_vmem [thread:$0]  %s5370_s2, 2048, %s31_s20, [#allocation6], %s4008_s15, %s4008_s15, %s4009_s16  }
  0x19   :  { %4001 = dma.done.wait [#allocation3], 2048  }
  0x1a   :  { %4002 = vsyncadd [#allocation3], 4294965248 }
  0x1b   :  { %4003 = dma.done.wait [#allocation6], 2048  }
  0x1c   :  { %4004 = vsyncadd [#allocation6], 4294965248  ;;  %v75_v0 = vld [vmem:[#allocation5 + $0x78] sm:$0xff]  ;;  %v74_v1 = vld [vmem:[#allocation5 + $0x70] sm:$0xff] }
  0x1d   :  { %v73_v2 = vld [vmem:[#allocation5 + $0x68] sm:$0xff]  ;;  %v4044_v3 = vand.u32 4294901760, %v75_v0  ;;  %v4046_v4 = vand.u32 4294901760, %v74_v1  ;;  %v72_v6 = vld [vmem:[#allocation5 + $0x60] sm:$0xff]  ;;  %v71_v7 = vld [vmem:[#allocation5 + $0x58] sm:$0xff] }
  0x1e   :  { %v4048_v5 = vand.u32 4294901760, %v73_v2  ;;  %v70_v8 = vld [vmem:[#allocation5 + $0x50] sm:$0xff]  ;;  %v4050_v9 = vand.u32 4294901760, %v72_v6  ;;  %v4052_v10 = vand.u32 4294901760, %v71_v7  ;;  %v69_v12 = vld [vmem:[#allocation5 + $0x48] sm:$0xff]  ;;  %v68_v13 = vld [vmem:[#allocation5 + $0x40] sm:$0xff] }
  0x1f   :  { %5532 = vst [vmem:[#allocation11_spill] sm:$0xff] %v4044_v3  ;;  %5533 = vst [vmem:[#allocation12_spill] sm:$0xff] %v4046_v4  ;;  %v4054_v11 = vand.u32 4294901760, %v70_v8  ;;  %3201 = vmatprep.subr.mxu0 %v4044_v3  ;;  %v4058_v14 = vsub.f32 %v75_v0, %v4044_v3  ;;  %v4061_v15 = vsub.f32 %v74_v1, %v4046_v4  ;;  %v4063_v16 = vand.u32 4294901760, %v69_v12  ;;  %v67_v18 = vld [vmem:[#allocation5 + $0x38] sm:$0xff]  ;;  %v66_v25 = vld [vmem:[#allocation5 + $0x30] sm:$0xff] }
  0x20   :  { %5534 = vst [vmem:[#allocation13_spill] sm:$0xff] %v4048_v5  ;;  %5535 = vst [vmem:[#allocation14_spill] sm:$0xff] %v4050_v9  ;;  %v4066_v17 = vsub.f32 %v73_v2, %v4048_v5  ;;  %3202 = vmatpush3.msra.mxu0 %v4044_v3  ;;  %v4070_v19 = vsub.f32 %v72_v6, %v4050_v9  ;;  %v4073_v20 = vsub.f32 %v71_v7, %v4052_v10  ;;  %v65_v35 = vld [vmem:[#allocation5 + $0x28] sm:$0xff]  ;;  %v64_v40 = vld [vmem:[#allocation5 + $0x20] sm:$0xff] }
  0x21   :  { %5536 = vst [vmem:[#allocation15_spill] sm:$0xff] %v4052_v10  ;;  %5537 = vst [vmem:[#allocation16_spill] sm:$0xff] %v4054_v11  ;;  %3203 = vmatprep.subr.mxu0 %v4046_v4  ;;  %v4077_v21 = vand.u32 4294901760, %v4058_v14  ;;  %v4080_v22 = vand.u32 4294901760, %v4061_v15  ;;  %v4085_v24 = vand.u32 4294901760, %v68_v13  ;;  %v4091_v27 = vand.u32 4294901760, %v67_v18 }
  0x22   :  { %5538 = vst [vmem:[#allocation17_spill] sm:$0xff] %v4058_v14  ;;  %5539 = vst [vmem:[#allocation18_spill] sm:$0xff] %v4061_v15  ;;  %v4083_v23 = vand.u32 4294901760, %v4066_v17  ;;  %3204 = vmatpush3.msra.mxu0 %v4046_v4  ;;  %v4089_v26 = vand.u32 4294901760, %v4070_v19  ;;  %v4094_v28 = vand.u32 4294901760, %v4073_v20  ;;  %v4097_v29 = vsub.f32 %v70_v8, %v4054_v11  ;;  %v43_v47 = vld [vmem:[#allocation2] sm:$0xff] }
  0x23   :  { %5540 = vst [vmem:[#allocation19_spill] sm:$0xff] %v4063_v16  ;;  %5541 = vst [vmem:[#allocation20_spill] sm:$0xff] %v4066_v17  ;;  %3205 = vmatprep.subr.mxu0 %v4048_v5  ;;  %v321_v30 = vsub.f32 %v4058_v14, %v4077_v21  ;;  %v328_v31 = vsub.f32 %v4061_v15, %v4080_v22  ;;  %v4107_v33 = vsub.f32 %v69_v12, %v4063_v16  ;;  %v44_v49 = vld [vmem:[#allocation2 + $0x8] sm:$0xff]  ;;  %v63_v53 = vld [vmem:[#allocation5 + $0x18] sm:$0xff] }
  0x24   :  { %5542 = vst [vmem:[#allocation21_spill] sm:$0xff] %v4070_v19  ;;  %5543 = vst [vmem:[#allocation22_spill] sm:$0xff] %v4073_v20  ;;  %v335_v32 = vsub.f32 %v4066_v17, %v4083_v23  ;;  %3206 = vmatpush3.msra.mxu0 %v4048_v5  ;;  %v4110_v34 = vand.u32 4294901760, %v66_v25  ;;  %v342_v38 = vsub.f32 %v4070_v19, %v4089_v26  ;;  %v4120_v39 = vand.u32 4294901760, %v4097_v29  ;;  %v62_v59 = vld [vmem:[#allocation5 + $0x10] sm:$0xff]  ;;  %v61_v6 = vld [vmem:[#allocation5 + $0x8] sm:$0xff] }
  0x25   :  { %5544 = vst [vmem:[#allocation23_spill] sm:$0xff] %v4077_v21  ;;  %5545 = vst [vmem:[#allocation24_spill] sm:$0xff] %v4080_v22  ;;  %3207 = vmatprep.subr.mxu0 %v4050_v9  ;;  %v4113_v36 = vand.u32 4294901760, %v321_v30  ;;  %v4115_v37 = vand.u32 4294901760, %v328_v31  ;;  %v4124_v41 = vand.u32 4294901760, %v4107_v33  ;;  %v4127_v42 = vsub.f32 %v68_v13, %v4085_v24  ;;  %v45_v63 = vld [vmem:[#allocation2 + $0x10] sm:$0xff] }
  0x26   :  { %5546 = vst [vmem:[#allocation25_spill] sm:$0xff] %v4083_v23  ;;  %5547 = vst [vmem:[#allocation26_spill] sm:$0xff] %v4085_v24  ;;  %3208 = vmatpush3.msra.mxu0 %v4050_v9  ;;  %v4131_v43 = vand.u32 4294901760, %v335_v32  ;;  %v349_v44 = vsub.f32 %v4073_v20, %v4094_v28  ;;  %v4135_v45 = vand.u32 4294901760, %v65_v35  ;;  %v4138_v46 = vsub.f32 %v67_v18, %v4091_v27  ;;  %v46_v18 = vld [vmem:[#allocation2 + $0x18] sm:$0xff]  ;;  %v60_v31 = vld [vmem:[#allocation5] sm:$0xff] }
  0x27   :  { %5548 = vst [vmem:[#allocation27_spill] sm:$0xff] %v4089_v26  ;;  %5549 = vst [vmem:[#allocation28_spill] sm:$0xff] %v4091_v27  ;;  %3209 = vmatprep.subr.mxu0 %v4052_v10  ;;  %3257 = vmatprep.subr.mxu1 %v4113_v36  ;;  %v4142_v48 = vand.u32 4294901760, %v64_v40  ;;  %v4146_v50 = vand.u32 4294901760, %v342_v38  ;;  %v356_v51 = vsub.f32 %v4097_v29, %v4120_v39  ;;  %v4151_v52 = vand.u32 4294901760, %v4127_v42  ;;  %v52_v22 = vld [vmem:[#allocation2 + $0x48] sm:$0xff] }
  0x28   :  { %5550 = vst [vmem:[#allocation29_spill] sm:$0xff] %v4094_v28  ;;  %5551 = vst [vmem:[#allocation30_spill] sm:$0xff] %v4097_v29  ;;  %3210 = vmatpush3.msra.mxu0 %v4052_v10  ;;  %3258 = vmatpush3.msra.mxu1 %v4113_v36  ;;  %v4154_v54 = vsub.f32 %v66_v25, %v4110_v34  ;;  %v363_v55 = vsub.f32 %v4107_v33, %v4124_v41  ;;  %v4160_v56 = vand.u32 4294901760, %v43_v47 }
  0x29   :  { %5552 = vst [vmem:[#allocation31_spill] sm:$0xff] %v4107_v33  ;;  %5553 = vst [vmem:[#allocation32_spill] sm:$0xff] %v4110_v34  ;;  %3211 = vmatprep.subr.mxu0 %v4054_v11  ;;  %3259 = vmatprep.subr.mxu1 %v4115_v37  ;;  %v4164_v57 = vand.u32 4294901760, %v349_v44  ;;  %v4167_v58 = vand.u32 4294901760, %v4138_v46  ;;  %v4170_v60 = vsub.f32 %v65_v35, %v4135_v45  ;;  %v4172_v61 = vand.u32 4294901760, %v44_v49 }
  0x2a   :  { %5554 = vst [vmem:[#allocation33_spill] sm:$0xff] %v4113_v36  ;;  %5555 = vst [vmem:[#allocation34_spill] sm:$0xff] %v4115_v37  ;;  %3212 = vmatpush3.msra.mxu0 %v4054_v11  ;;  %3260 = vmatpush3.msra.mxu1 %v4115_v37  ;;  %v4176_v62 = vand.u32 4294901760, %v63_v53  ;;  %v4180_v0 = vand.u32 4294901760, %v356_v51  ;;  %v370_v1 = vsub.f32 %v4127_v42, %v4151_v52  ;;  %v4185_v2 = vand.u32 4294901760, %v4154_v54  ;;  %v48_v36 = vld [vmem:[#allocation2 + $0x28] sm:$0xff] }
  0x2b   :  { %5556 = vst [vmem:[#allocation35_spill] sm:$0xff] %v4120_v39  ;;  %5557 = vst [vmem:[#allocation36_spill] sm:$0xff] %v4124_v41  ;;  %3213 = vmatprep.subr.mxu0 %v4063_v16  ;;  %3261 = vmatprep.subr.mxu1 %v4131_v43  ;;  %v4188_v7 = vsub.f32 %v64_v40, %v4142_v48  ;;  %v4192_v8 = vand.u32 4294901760, %v363_v55  ;;  %v4194_v12 = vand.u32 4294901760, %v62_v59  ;;  %v4204_v30 = vand.u32 4294901760, %v4170_v60  ;;  %v47_v55 = vld [vmem:[#allocation2 + $0x20] sm:$0xff] }
  0x2c   :  { %5558 = vst [vmem:[#allocation37_spill] sm:$0xff] %v4127_v42  ;;  %5559 = vst [vmem:[#allocation38_spill] sm:$0xff] %v4131_v43  ;;  %3214 = vmatpush3.msra.mxu0 %v4063_v16  ;;  %3262 = vmatpush3.msra.mxu1 %v4131_v43  ;;  %v4197_v13 = vsub.f32 %v43_v47, %v4160_v56  ;;  %v377_v25 = vsub.f32 %v4138_v46, %v4167_v58  ;;  %v4209_v35 = vand.u32 4294901760, %v45_v63 }
  0x2d   :  { %5560 = vst [vmem:[#allocation39_spill] sm:$0xff] %v4135_v45  ;;  %5561 = vst [vmem:[#allocation40_spill] sm:$0xff] %v4138_v46  ;;  %3215 = vmatprep.subr.mxu0 %v4085_v24  ;;  %3263 = vmatprep.subr.mxu1 %v4146_v50  ;;  %v4207_v32 = vsub.f32 %v44_v49, %v4172_v61  ;;  %v4213_v38 = vand.u32 4294901760, %v61_v6  ;;  %v4216_v40 = vsub.f32 %v63_v53, %v4176_v62 }
  0x2e   :  { %5562 = vst [vmem:[#allocation41_spill] sm:$0xff] %v4142_v48  ;;  %5563 = vst [vmem:[#allocation42_spill] sm:$0xff] %v4146_v50  ;;  %3216 = vmatpush3.msra.mxu0 %v4085_v24  ;;  %3264 = vmatpush3.msra.mxu1 %v4146_v50  ;;  %v4220_v44 = vand.u32 4294901760, %v370_v1  ;;  %v384_v47 = vsub.f32 %v4154_v54, %v4185_v2  ;;  %v4225_v49 = vand.u32 4294901760, %v4188_v7  ;;  %v4227_v51 = vand.u32 4294901760, %v46_v18 }
  0x2f   :  { %5564 = vst [vmem:[#allocation43_spill] sm:$0xff] %v4151_v52  ;;  %5565 = vst [vmem:[#allocation44_spill] sm:$0xff] %v4154_v54  ;;  %3217 = vmatprep.subr.mxu0 %v4091_v27  ;;  %3265 = vmatprep.subr.mxu1 %v4164_v57  ;;  %v4231_v53 = vand.u32 4294901760, %v60_v31  ;;  %v4235_v1 = vsub.f32 %v62_v59, %v4194_v12  ;;  %v4239_v50 = vand.u32 4294901760, %v377_v25  ;;  %v4250_v59 = vand.u32 4294901760, %v4216_v40 }
  0x30   :  { %5566 = vst [vmem:[#allocation45_spill] sm:$0xff] %v4164_v57  ;;  %5567 = vst [vmem:[#allocation46_spill] sm:$0xff] %v4167_v58  ;;  %3218 = vmatpush3.msra.mxu0 %v4091_v27  ;;  %3266 = vmatpush3.msra.mxu1 %v4164_v57  ;;  %v391_v43 = vsub.f32 %v4170_v60, %v4204_v30  ;;  %v4253_v57 = vsub.f32 %v61_v6, %v4213_v38  ;;  %v4255_v25 = vand.u32 4294901760, %v47_v55 }
  0x31   :  { %5568 = vst [vmem:[#allocation47_spill] sm:$0xff] %v4170_v60  ;;  %5569 = vst [vmem:[#allocation48_spill] sm:$0xff] %v4176_v62  ;;  %3219 = vmatprep.subr.mxu0 %v4110_v34  ;;  %3267 = vmatprep.subr.mxu1 %v4180_v0  ;;  %v4259_v37 = vand.u32 4294901760, %v384_v47  ;;  %v5587_v6 = vand.u32 4294901760, %v4197_v13  ;;  %v4274_v58 = vand.u32 4294901760, %v48_v36  ;;  %v4285_v52 = vsub.f32 %v60_v31, %v4231_v53 }
  0x32   :  { %5570 = vst [vmem:[#allocation49_spill] sm:$0xff] %v4180_v0  ;;  %5571 = vst [vmem:[#allocation50_spill] sm:$0xff] %v4185_v2  ;;  %3220 = vmatpush3.msra.mxu0 %v4110_v34  ;;  %3268 = vmatpush3.msra.mxu1 %v4180_v0  ;;  %v4245_v0 = vsub.f32 %v45_v63, %v4209_v35  ;;  %v398_v63 = vsub.f32 %v4188_v7, %v4225_v49  ;;  %v4272_v2 = vand.u32 4294901760, %v4235_v1 }
  0x33   :  { %5572 = vst [vmem:[#allocation51_spill] sm:$0xff] %v4188_v7  ;;  %5573 = vst [vmem:[#allocation52_spill] sm:$0xff] %v4192_v8  ;;  %3221 = vmatprep.subr.mxu0 %v4135_v45  ;;  %3269 = vmatprep.subr.mxu1 %v4192_v8  ;;  %v4278_v47 = vand.u32 4294901760, %v391_v43  ;;  %v405_v41 = vsub.f32 %v4216_v40, %v4250_v59  ;;  %v4292_v43 = vand.u32 4294901760, %v4253_v57 }
  0x34   :  { %5574 = vst [vmem:[#allocation53_spill] sm:$0xff] %v4194_v12  ;;  %5575 = vst [vmem:[#allocation54_spill] sm:$0xff] %v4204_v30  ;;  %3222 = vmatpush3.msra.mxu0 %v4135_v45  ;;  %3270 = vmatpush3.msra.mxu1 %v4192_v8  ;;  %v4264_v30 = vsub.f32 %v46_v18, %v4227_v51  ;;  %v160_v8 = vsub.f32 %v4197_v13, %v5587_v6  ;;  %v5590_v18 = vand.u32 4294901760, %v4207_v32  ;;  %v49_v6 = vld [vmem:[#allocation2 + $0x30] sm:$0xff] }
  0x35   :  { %5576 = vst [vmem:[#allocation55_spill] sm:$0xff] %v4213_v38  ;;  %5577 = vst [vmem:[#allocation56_spill] sm:$0xff] %v4216_v40  ;;  %3223 = vmatprep.subr.mxu0 %v4142_v48  ;;  %3271 = vmatprep.subr.mxu1 %v4220_v44  ;;  %v4295_v39 = vsub.f32 %v47_v55, %v4255_v25  ;;  %v4299_v31 = vand.u32 4294901760, %v398_v63  ;;  %v4307_v55 = vsub.f32 %v48_v36, %v4274_v58 }
  0x36   :  { %5578 = vst [vmem:[#allocation57_spill] sm:$0xff] %v4220_v44  ;;  %5579 = vst [vmem:[#allocation58_spill] sm:$0xff] %v4225_v49  ;;  %3224 = vmatpush3.msra.mxu0 %v4142_v48  ;;  %3272 = vmatpush3.msra.mxu1 %v4220_v44  ;;  %v170_v49 = vsub.f32 %v4207_v32, %v5590_v18  ;;  %v50_v44 = vld [vmem:[#allocation2 + $0x38] sm:$0xff]  ;;  %v4309_v28 = vand.u32 4294901760, %v49_v6  ;;  %v5594_v18 = vand.u32 4294901760, %v4245_v0  ;;  %v4321_v36 = vand.u32 4294901760, %v405_v41 }
  0x37   :  { %5580 = vst [vmem:[#allocation59_spill] sm:$0xff] %v4231_v53  ;;  %5581 = vst [vmem:[#allocation60_spill] sm:$0xff] %v4235_v1  ;;  %3225 = vmatprep.subr.mxu0 %v4176_v62  ;;  %3273 = vmatprep.subr.mxu1 %v4239_v50  ;;  %v4326_v23 = vand.u32 4294901760, %v50_v44 }
  0x38   :  { %5582 = vst [vmem:[#allocation61_spill] sm:$0xff] %v4239_v50  ;;  %5583 = vst [vmem:[#allocation62_spill] sm:$0xff] %v4245_v0  ;;  %3226 = vmatpush3.msra.mxu0 %v4176_v62  ;;  %3274 = vmatpush3.msra.mxu1 %v4239_v50  ;;  %v161_v50 = vand.u32 4294901760, %v160_v8  ;;  %v171_v63 = vand.u32 4294901760, %v170_v49  ;;  %v180_v26 = vsub.f32 %v4245_v0, %v5594_v18  ;;  %v5597_v49 = vand.u32 4294901760, %v4264_v30 }
  0x39   :  { %5584 = vst [vmem:[#allocation63_spill] sm:$0xff] %v4250_v59  ;;  %5585 = vst [vmem:[#allocation64_spill] sm:$0xff] %v4253_v57  ;;  %3227 = vmatprep.subr.mxu0 %v4194_v12  ;;  %3275 = vmatprep.subr.mxu1 %v4259_v37  ;;  %v412_v59 = vsub.f32 %v4235_v1, %v4272_v2  ;;  %v419_v8 = vsub.f32 %v4253_v57, %v4292_v43 }
  0x3a   :  { %5586 = vst [vmem:[#allocation65_spill] sm:$0xff] %v4259_v37  ;;  %5588 = vst [vmem:[#allocation66_spill] sm:$0xff] %v4272_v2  ;;  %3228 = vmatpush3.msra.mxu0 %v4194_v12  ;;  %3276 = vmatpush3.msra.mxu1 %v4259_v37  ;;  %v4317_v37 = vand.u32 4294901760, %v4285_v52  ;;  %v190_v18 = vsub.f32 %v4264_v30, %v5597_v49  ;;  %v4338_v2 = vsub.f32 %v49_v6, %v4309_v28 }
  0x3b   :  { %5589 = vst [vmem:[#allocation67_spill] sm:$0xff] %v4278_v47  ;;  %5591 = vst [vmem:[#allocation68_spill] sm:$0xff] %v4285_v52  ;;  %3229 = vmatprep.subr.mxu0 %v4213_v38  ;;  %3277 = vmatprep.subr.mxu1 %v4278_v47  ;;  %v4334_v41 = vand.u32 4294901760, %v412_v59  ;;  %v5600_v59 = vand.u32 4294901760, %v4295_v39  ;;  %v4351_v6 = vsub.f32 %v50_v44, %v4326_v23 }
  0x3c   :  { %5592 = vst [vmem:[#allocation69_spill] sm:$0xff] %v4292_v43  ;;  %5593 = vst [vmem:[#allocation70_spill] sm:$0xff] %v4299_v31  ;;  %3230 = vmatpush3.msra.mxu0 %v4213_v38  ;;  %3278 = vmatpush3.msra.mxu1 %v4278_v47  ;;  %v51_v38 = vld [vmem:[#allocation2 + $0x40] sm:$0xff]  ;;  %v181_v43 = vand.u32 4294901760, %v180_v26  ;;  %v426_v0 = vsub.f32 %v4285_v52, %v4317_v37  ;;  %v191_v26 = vand.u32 4294901760, %v190_v18 }
  0x3d   :  { %5595 = vst [vmem:[#allocation71_spill] sm:$0xff] %v4317_v37  ;;  %5596 = vst [vmem:[#allocation72_spill] sm:$0xff] %v4321_v36  ;;  %3231 = vmatprep.subr.mxu0 %v4231_v53  ;;  %3279 = vmatprep.subr.mxu1 %v4299_v31  ;;  %v200_v49 = vsub.f32 %v4295_v39, %v5600_v59  ;;  %v4353_v47 = vand.u32 4294901760, %v51_v38  ;;  %v5436_v59 = vand.u32 4294901760, %v4338_v2 }
  0x3e   :  { %3232 = vmatpush3.msra.mxu0 %v4231_v53  ;;  %3233 = vmatprep.mubr.f32.mxu0 %v161_v50  ;;  %5598 = vst [vmem:[#allocation73_spill] sm:$0xff] %v4334_v41  ;;  %v4345_v50 = vand.u32 4294901760, %v419_v8  ;;  %v4366_v44 = vand.u32 4294901760, %v426_v0 }
  0x3f   :  { %3280 = vmatpush3.msra.mxu1 %v4299_v31  ;;  %3234 = vmatmul.mubr.f32.vlgmr.msra.gmra.mxu0 %v171_v63  ;;  %v5601_v63 = vand.u32 4294901760, %v4307_v55  ;;  %v4363_v31 = vand.u32 4294901760, %v52_v22  ;;  %v201_v18 = vand.u32 4294901760, %v200_v49  ;;  %v4372_v37 = vsub.f32 %v51_v38, %v4353_v47 }
  0x40   :  { %3281 = vmatprep.subr.mxu1 %v4321_v36  ;;  %3313 = vmatprep.subr.mxu0 %v4058_v14  ;;  %5599 = vst [vmem:[#allocation74_spill] sm:$0xff] %v4345_v50  ;;  %5602 = vst [vmem:[#allocation75_spill] sm:$0xff] %v4366_v44  ;;  %v5603_v38 = vand.u32 4294901760, %v4351_v6 }
  0x41   :  { %3282 = vmatpush3.msra.mxu1 %v4321_v36  ;;  %3314 = vmatpush3.msra.mxu0 %v4058_v14  ;;  %v210_v8 = vsub.f32 %v4307_v55, %v5601_v63  ;;  %v53_v36 = vld [vmem:[#allocation2 + $0x50] sm:$0xff]  ;;  %v54_v63 = vld [vmem:[#allocation2 + $0x58] sm:$0xff]  ;;  %v4381_v49 = vsub.f32 %v52_v22, %v4363_v31  ;;  %v55_v22 = vld [vmem:[#allocation2 + $0x60] sm:$0xff] }
  0x42   :  { %3283 = vmatprep.subr.mxu1 %v4334_v41  ;;  %3315 = vmatprep.subr.mxu0 %v4061_v15  ;;  %v4383_v14 = vand.u32 4294901760, %v53_v36 }
  0x43   :  { %3236 = vmatprep.mubr.f32.mxu0 %v181_v43  ;;  %3284 = vmatpush3.msra.mxu1 %v4334_v41  ;;  %v211_v0 = vand.u32 4294901760, %v210_v8  ;;  %v220_v43 = vsub.f32 %v4338_v2, %v5436_v59 }
  0x44   :  { %3316 = vmatpush3.msra.mxu0 %v4061_v15  ;;  %3285 = vmatprep.subr.mxu1 %v4345_v50  ;;  %v4399_v15 = vsub.f32 %v53_v36, %v4383_v14  ;;  %v5605_v36 = vand.u32 4294901760, %v4381_v49 }
  0x45   :  { %3237 = vmatmul.mubr.f32.gmra.mxu0 %v191_v26  ;;  %3317 = vmatprep.subr.mxu0 %v4066_v17  ;;  %v230_v26 = vsub.f32 %v4351_v6, %v5603_v38  ;;  %v221_v59 = vand.u32 4294901760, %v220_v43  ;;  %v56_v38 = vld [vmem:[#allocation2 + $0x68] sm:$0xff] }
  0x46   :  { %3286 = vmatpush3.msra.mxu1 %v4345_v50  ;;  %3318 = vmatpush3.msra.mxu0 %v4066_v17  ;;  %v4392_v17 = vand.u32 4294901760, %v54_v63 }
  0x47   :  { %3287 = vmatprep.subr.mxu1 %v4366_v44  ;;  %3319 = vmatprep.subr.mxu0 %v4070_v19  ;;  %v231_v8 = vand.u32 4294901760, %v230_v26  ;;  %v250_v26 = vsub.f32 %v4381_v49, %v5605_v36  ;;  %v58_v36 = vld [vmem:[#allocation2 + $0x78] sm:$0xff] }
  0x48   :  { %3239 = vmatprep.mubr.f32.mxu0 %v201_v18  ;;  %3288 = vmatpush3.msra.mxu1 %v4366_v44  ;;  %v4409_v43 = vsub.f32 %v54_v63, %v4392_v17  ;;  %v4411_v18 = vand.u32 4294901760, %v55_v22  ;;  %v4420_v44 = vand.u32 4294901760, %v56_v38  ;;  %v57_v63 = vld [vmem:[#allocation2 + $0x70] sm:$0xff]  ;;  %v4448_v41 = vand.u32 4294901760, %v58_v36 }
  0x49   :  { %3289 = vmatprep.mubr.f32.mxu1 %v4160_v56  ;;  %3320 = vmatpush3.msra.mxu0 %v4070_v19 }
  0x4a   :  { %3240 = vmatmul.mubr.f32.gmra.mxu0 %v211_v0  ;;  %3290 = vmatmul.mubr.f32.vlgmr.msra.gmra.mxu1 %v4172_v61  ;;  %v5604_v0 = vand.u32 4294901760, %v4372_v37  ;;  %v4427_v50 = vsub.f32 %v55_v22, %v4411_v18  ;;  %v5607_v22 = vand.u32 4294901760, %v4409_v43 }
  0x4b   :  { %3321 = vmatprep.subr.mxu0 %v4073_v20  ;;  %3369 = vmatprep.subr.mxu1 %v4044_v3 }
  0x4c   :  { %3322 = vmatpush3.msra.mxu0 %v4073_v20  ;;  %3370 = vmatpush3.msra.mxu1 %v4044_v3  ;;  %v240_v19 = vsub.f32 %v4372_v37, %v5604_v0  ;;  %v251_v20 = vand.u32 4294901760, %v250_v26  ;;  %v270_v26 = vsub.f32 %v4409_v43, %v5607_v22 }
  0x4d   :  { %3323 = vmatprep.subr.mxu0 %v4097_v29  ;;  %3371 = vmatprep.subr.mxu1 %v4046_v4 }
  0x4e   :  { %3242 = vmatprep.mubr.f32.mxu0 %v221_v59  ;;  %3292 = vmatprep.mubr.f32.mxu1 %v4209_v35  ;;  %v241_v0 = vand.u32 4294901760, %v240_v19  ;;  %v4437_v19 = vsub.f32 %v56_v38, %v4420_v44  ;;  %v4439_v59 = vand.u32 4294901760, %v57_v63  ;;  %v271_v22 = vand.u32 4294901760, %v270_v26 }
  0x4f   :  { %3324 = vmatpush3.msra.mxu0 %v4097_v29  ;;  %3372 = vmatpush3.msra.mxu1 %v4046_v4 }
  0x50   :  { %3243 = vmatmul.mubr.f32.gmra.mxu0 %v231_v8  ;;  %3293 = vmatmul.mubr.f32.gmra.mxu1 %v4227_v51  ;;  %v5606_v8 = vand.u32 4294901760, %v4399_v15 }
  0x51   :  { %3325 = vmatprep.subr.mxu0 %v4107_v33  ;;  %3373 = vmatprep.subr.mxu1 %v4048_v5 }
  0x52   :  { %3326 = vmatpush3.msra.mxu0 %v4107_v33  ;;  %3374 = vmatpush3.msra.mxu1 %v4048_v5  ;;  %v260_v29 = vsub.f32 %v4399_v15, %v5606_v8  ;;  %v5453_v33 = vand.u32 4294901760, %v4427_v50  ;;  %v4455_v8 = vsub.f32 %v57_v63, %v4439_v59 }
  0x53   :  { %3327 = vmatprep.subr.mxu0 %v4127_v42  ;;  %3375 = vmatprep.subr.mxu1 %v4050_v9 }
  0x54   :  { %3245 = vmatprep.mubr.f32.mxu0 %v241_v0  ;;  %3295 = vmatprep.mubr.f32.mxu1 %v4255_v25  ;;  %v261_v38 = vand.u32 4294901760, %v260_v29  ;;  %v5454_v0 = vand.u32 4294901760, %v4437_v19  ;;  %v4465_v29 = vsub.f32 %v58_v36, %v4448_v41  ;;  %v5456_v26 = vand.u32 4294901760, %v4455_v8 }
  0x55   :  { %3328 = vmatpush3.msra.mxu0 %v4127_v42  ;;  %3376 = vmatpush3.msra.mxu1 %v4050_v9 }
  0x56   :  { %3246 = vmatmul.mubr.f32.gmra.mxu0 %v251_v20  ;;  %3296 = vmatmul.mubr.f32.gmra.mxu1 %v4274_v58  ;;  %v280_v20 = vsub.f32 %v4427_v50, %v5453_v33  ;;  %v290_v63 = vsub.f32 %v4437_v19, %v5454_v0  ;;  %v5455_v33 = vand.u32 4294901760, %v4465_v29  ;;  %v300_v0 = vsub.f32 %v4455_v8, %v5456_v26  ;;  %v5615_v26 = vld [vmem:[#allocation29_spill] sm:$0xff] }
  0x57   :  { %3329 = vmatprep.subr.mxu0 %v4138_v46  ;;  %3377 = vmatprep.subr.mxu1 %v4052_v10 }
  0x58   :  { %3330 = vmatpush3.msra.mxu0 %v4138_v46  ;;  %3378 = vmatpush3.msra.mxu1 %v4052_v10  ;;  %v281_v36 = vand.u32 4294901760, %v280_v20  ;;  %v301_v20 = vand.u32 4294901760, %v300_v0  ;;  %v5608_v0 = vld [vmem:[#allocation24_spill] sm:$0xff] }
  0x59   :  { %3331 = vmatprep.subr.mxu0 %v4154_v54  ;;  %3379 = vmatprep.subr.mxu1 %v4054_v11 }
  0x5a   :  { %3248 = vmatprep.mubr.f32.mxu0 %v261_v38  ;;  %3298 = vmatprep.mubr.f32.mxu1 %v4309_v28  ;;  %v291_v38 = vand.u32 4294901760, %v290_v63 }
  0x5b   :  { %3332 = vmatpush3.msra.mxu0 %v4154_v54  ;;  %3380 = vmatpush3.msra.mxu1 %v4054_v11 }
  0x5c   :  { %3249 = vmatmul.mubr.f32.gmra.mxu0 %v271_v22  ;;  %3299 = vmatmul.mubr.f32.gmra.mxu1 %v4326_v23  ;;  %v310_v22 = vsub.f32 %v4465_v29, %v5455_v33  ;;  %v5614_v33 = vand.u32 4294901760, %v4207_v32 }
  0x5d   :  { %3333 = vmatprep.subr.mxu0 %v4170_v60  ;;  %3381 = vmatprep.subr.mxu1 %v4063_v16 }
  0x5e   :  { %3334 = vmatpush3.msra.mxu0 %v4170_v60  ;;  %3382 = vmatpush3.msra.mxu1 %v4063_v16  ;;  %v311_v63 = vand.u32 4294901760, %v310_v22  ;;  %v5611_v22 = vld [vmem:[#allocation25_spill] sm:$0xff] }
  0x5f   :  { %3335 = vmatprep.subr.mxu0 %v4188_v7  ;;  %3383 = vmatprep.subr.mxu1 %v4085_v24 }
  0x60   :  { %3251 = vmatprep.mubr.f32.mxu0 %v281_v36  ;;  %3301 = vmatprep.mubr.f32.mxu1 %v4353_v47  ;;  %v5609_v36 = vld [vmem:[#allocation62_spill] sm:$0xff] }
  0x61   :  { %3336 = vmatpush3.msra.mxu0 %v4188_v7  ;;  %3384 = vmatpush3.msra.mxu1 %v4085_v24 }
  0x62   :  { %3252 = vmatmul.mubr.f32.gmra.mxu0 %v291_v38  ;;  %3302 = vmatmul.mubr.f32.gmra.mxu1 %v4363_v31  ;;  %v5610_v38 = vld [vmem:[#allocation55_spill] sm:$0xff] }
  0x63   :  { %3337 = vmatprep.subr.mxu0 %v4216_v40  ;;  %3385 = vmatprep.subr.mxu1 %v4091_v27 }
  0x64   :  { %3338 = vmatpush3.msra.mxu0 %v4216_v40  ;;  %3386 = vmatpush3.msra.mxu1 %v4091_v27 }
  0x65   :  { %3339 = vmatprep.subr.mxu0 %v4235_v1  ;;  %3387 = vmatprep.subr.mxu1 %v4110_v34 }
  0x66   :  { %3254 = vmatprep.mubr.f32.mxu0 %v301_v20  ;;  %3304 = vmatprep.mubr.f32.mxu1 %v4383_v14  ;;  %v5612_v20 = vld [vmem:[#allocation27_spill] sm:$0xff] }
  0x67   :  { %3340 = vmatpush3.msra.mxu0 %v4235_v1  ;;  %3388 = vmatpush3.msra.mxu1 %v4110_v34 }
  0x68   :  { %3255 = vmatmul.mubr.f32.gmra.mxu0 %v311_v63  ;;  %3305 = vmatmul.mubr.f32.gmra.mxu1 %v4392_v17  ;;  %v5613_v63 = vand.u32 4294901760, %v4197_v13 }
  0x69   :  { %3341 = vmatprep.subr.mxu0 %v4253_v57  ;;  %3389 = vmatprep.subr.mxu1 %v4135_v45 }
  0x6a   :  { %3342 = vmatpush3.msra.mxu0 %v4253_v57  ;;  %3390 = vmatpush3.msra.mxu1 %v4135_v45 }
  0x6b   :  { %3343 = vmatprep.subr.mxu0 %v4285_v52  ;;  %3391 = vmatprep.subr.mxu1 %v4142_v48 }
  0x6c   :  { %3307 = vmatprep.mubr.f32.mxu1 %v4411_v18  ;;  %3344 = vmatpush3.msra.mxu0 %v4285_v52 }
  0x6d   :  { %3345 = vmatprep.mubr.f32.mxu0 %v4197_v13  ;;  %3392 = vmatpush3.msra.mxu1 %v4142_v48  ;;  %v5617_v13 = vand.u32 4294901760, %v5609_v36 }
  0x6e   :  { %3308 = vmatmul.mubr.f32.gmra.mxu1 %v4420_v44  ;;  %3346 = vmatmul.mubr.f32.vlgmr.msra.gmra.mxu0 %v4207_v32  ;;  %v5619_v32 = vld [vmem:[#allocation36_spill] sm:$0xff] }
  0x6f   :  { %3393 = vmatprep.subr.mxu1 %v4176_v62  ;;  %3425 = vmatprep.subr.mxu0 %v4077_v21 }
  0x70   :  { %3394 = vmatpush3.msra.mxu1 %v4176_v62  ;;  %3426 = vmatpush3.msra.mxu0 %v4077_v21 }
  0x71   :  { %3395 = vmatprep.subr.mxu1 %v4194_v12  ;;  %3427 = vmatprep.subr.mxu0 %v5608_v0 }
  0x72   :  { %3310 = vmatprep.mubr.f32.mxu1 %v4439_v59  ;;  %3348 = vmatprep.mubr.f32.mxu0 %v5609_v36  ;;  %v5621_v36 = vand.u32 4294901760, %v4295_v39 }
  0x73   :  { %3396 = vmatpush3.msra.mxu1 %v4194_v12  ;;  %3428 = vmatpush3.msra.mxu0 %v5608_v0 }
  0x74   :  { %3311 = vmatmul.mubr.f32.gmra.mxu1 %v4448_v41  ;;  %3349 = vmatmul.mubr.f32.gmra.mxu0 %v4264_v30 }
  0x75   :  { %3397 = vmatprep.subr.mxu1 %v5610_v38  ;;  %3429 = vmatprep.subr.mxu0 %v5611_v22 }
  0x76   :  { %3398 = vmatpush3.msra.mxu1 %v5610_v38  ;;  %3430 = vmatpush3.msra.mxu0 %v5611_v22  ;;  %v5616_v22 = vld [vmem:[#allocation35_spill] sm:$0xff] }
  0x77   :  { %3399 = vmatprep.subr.mxu1 %v4231_v53  ;;  %3431 = vmatprep.subr.mxu0 %v5612_v20 }
  0x78   :  { %3351 = vmatprep.mubr.f32.mxu0 %v4295_v39  ;;  %3400 = vmatpush3.msra.mxu1 %v4231_v53  ;;  %v5625_v39 = vand.u32 4294901760, %v4338_v2 }
  0x79   :  { %3401 = vmatprep.mubr.f32.mxu1 %v5613_v63  ;;  %3432 = vmatpush3.msra.mxu0 %v5612_v20  ;;  %v5620_v63 = vld [vmem:[#allocation43_spill] sm:$0xff] }
  0x7a   :  { %3352 = vmatmul.mubr.f32.gmra.mxu0 %v4307_v55  ;;  %3402 = vmatmul.mubr.f32.vlgmr.msra.gmra.mxu1 %v5614_v33  ;;  %v5618_v33 = vand.u32 4294901760, %v4264_v30  ;;  %v5622_v30 = vand.u32 4294901760, %v4307_v55  ;;  %v5626_v55 = vand.u32 4294901760, %v4351_v6 }
  0x7b   :  { %3433 = vmatprep.subr.mxu0 %v5615_v26  ;;  %3481 = vmatprep.subr.mxu1 %v4044_v3 }
  0x7c   :  { %3434 = vmatpush3.msra.mxu0 %v5615_v26  ;;  %3482 = vmatpush3.msra.mxu1 %v4044_v3 }
  0x7d   :  { %3435 = vmatprep.subr.mxu0 %v5616_v22  ;;  %3483 = vmatprep.subr.mxu1 %v4046_v4 }
  0x7e   :  { %3354 = vmatprep.mubr.f32.mxu0 %v4338_v2  ;;  %3404 = vmatprep.mubr.f32.mxu1 %v5617_v13  ;;  %v5623_v13 = vld [vmem:[#allocation46_spill] sm:$0xff]  ;;  %v5629_v2 = vand.u32 4294901760, %v4372_v37 }
  0x7f   :  { %3436 = vmatpush3.msra.mxu0 %v5616_v22  ;;  %3484 = vmatpush3.msra.mxu1 %v4046_v4 }
  0x80   :  { %3355 = vmatmul.mubr.f32.gmra.mxu0 %v4351_v6  ;;  %3405 = vmatmul.mubr.f32.gmra.mxu1 %v5618_v33  ;;  %v5624_v33 = vld [vmem:[#allocation50_spill] sm:$0xff]  ;;  %v5630_v6 = vand.u32 4294901760, %v4381_v49 }
  0x81   :  { %3437 = vmatprep.subr.mxu0 %v5619_v32  ;;  %3485 = vmatprep.subr.mxu1 %v4048_v5 }
  0x82   :  { %3438 = vmatpush3.msra.mxu0 %v5619_v32  ;;  %3486 = vmatpush3.msra.mxu1 %v4048_v5 }
  0x83   :  { %3439 = vmatprep.subr.mxu0 %v5620_v63  ;;  %3487 = vmatprep.subr.mxu1 %v4050_v9 }
  0x84   :  { %3357 = vmatprep.mubr.f32.mxu0 %v4372_v37  ;;  %3407 = vmatprep.mubr.f32.mxu1 %v5621_v36  ;;  %v5627_v36 = vld [vmem:[#allocation54_spill] sm:$0xff]  ;;  %v5633_v37 = vand.u32 4294901760, %v4399_v15 }
  0x85   :  { %3440 = vmatpush3.msra.mxu0 %v5620_v63  ;;  %3488 = vmatpush3.msra.mxu1 %v4050_v9 }
  0x86   :  { %3358 = vmatmul.mubr.f32.gmra.mxu0 %v4381_v49  ;;  %3408 = vmatmul.mubr.f32.gmra.mxu1 %v5622_v30  ;;  %v5628_v30 = vld [vmem:[#allocation58_spill] sm:$0xff]  ;;  %v5634_v49 = vand.u32 4294901760, %v4409_v43 }
  0x87   :  { %3441 = vmatprep.subr.mxu0 %v5623_v13  ;;  %3489 = vmatprep.subr.mxu1 %v4052_v10 }
  0x88   :  { %3442 = vmatpush3.msra.mxu0 %v5623_v13  ;;  %3490 = vmatpush3.msra.mxu1 %v4052_v10 }
  0x89   :  { %3443 = vmatprep.subr.mxu0 %v5624_v33  ;;  %3491 = vmatprep.subr.mxu1 %v4054_v11 }
  0x8a   :  { %3360 = vmatprep.mubr.f32.mxu0 %v4399_v15  ;;  %3410 = vmatprep.mubr.f32.mxu1 %v5625_v39  ;;  %v5631_v39 = vld [vmem:[#allocation63_spill] sm:$0xff]  ;;  %v5637_v15 = vand.u32 4294901760, %v4427_v50 }
  0x8b   :  { %3444 = vmatpush3.msra.mxu0 %v5624_v33  ;;  %3492 = vmatpush3.msra.mxu1 %v4054_v11 }
  0x8c   :  { %3361 = vmatmul.mubr.f32.gmra.mxu0 %v4409_v43  ;;  %3411 = vmatmul.mubr.f32.gmra.mxu1 %v5626_v55  ;;  %v5632_v55 = vld [vmem:[#allocation66_spill] sm:$0xff]  ;;  %v5638_v43 = vand.u32 4294901760, %v4437_v19 }
  0x8d   :  { %3445 = vmatprep.subr.mxu0 %v5627_v36  ;;  %3493 = vmatprep.subr.mxu1 %v4063_v16 }
  0x8e   :  { %3446 = vmatpush3.msra.mxu0 %v5627_v36  ;;  %3494 = vmatpush3.msra.mxu1 %v4063_v16 }
  0x8f   :  { %3447 = vmatprep.subr.mxu0 %v5628_v30  ;;  %3495 = vmatprep.subr.mxu1 %v4085_v24 }
  0x90   :  { %3363 = vmatprep.mubr.f32.mxu0 %v4427_v50  ;;  %3413 = vmatprep.mubr.f32.mxu1 %v5629_v2  ;;  %v5635_v2 = vld [vmem:[#allocation69_spill] sm:$0xff]  ;;  %v5640_v50 = vand.u32 4294901760, %v4465_v29 }
  0x91   :  { %3448 = vmatpush3.msra.mxu0 %v5628_v30  ;;  %3496 = vmatpush3.msra.mxu1 %v4085_v24 }
  0x92   :  { %3364 = vmatmul.mubr.f32.gmra.mxu0 %v4437_v19  ;;  %3414 = vmatmul.mubr.f32.gmra.mxu1 %v5630_v6  ;;  %v5636_v6 = vld [vmem:[#allocation71_spill] sm:$0xff]  ;;  %v5641_v19 = vld [vmem:[#allocation33_spill] sm:$0xff] }
  0x93   :  { %3449 = vmatprep.subr.mxu0 %v5631_v39  ;;  %3497 = vmatprep.subr.mxu1 %v4091_v27 }
  0x94   :  { %3450 = vmatpush3.msra.mxu0 %v5631_v39  ;;  %3498 = vmatpush3.msra.mxu1 %v4091_v27 }
  0x95   :  { %3451 = vmatprep.subr.mxu0 %v5632_v55  ;;  %3499 = vmatprep.subr.mxu1 %v4110_v34 }
  0x96   :  { %3366 = vmatprep.mubr.f32.mxu0 %v4455_v8  ;;  %3416 = vmatprep.mubr.f32.mxu1 %v5633_v37  ;;  %v5639_v37 = vand.u32 4294901760, %v4455_v8  ;;  %v5642_v8 = vld [vmem:[#allocation34_spill] sm:$0xff] }
  0x97   :  { %3452 = vmatpush3.msra.mxu0 %v5632_v55  ;;  %3500 = vmatpush3.msra.mxu1 %v4110_v34 }
  0x98   :  { %3367 = vmatmul.mubr.f32.gmra.mxu0 %v4465_v29  ;;  %3417 = vmatmul.mubr.f32.gmra.mxu1 %v5634_v49 }
  0x99   :  { %3453 = vmatprep.subr.mxu0 %v5635_v2  ;;  %3501 = vmatprep.subr.mxu1 %v4135_v45 }
  0x9a   :  { %3454 = vmatpush3.msra.mxu0 %v5635_v2  ;;  %3502 = vmatpush3.msra.mxu1 %v4135_v45 }
  0x9b   :  { %3455 = vmatprep.subr.mxu0 %v5636_v6  ;;  %3503 = vmatprep.subr.mxu1 %v4142_v48 }
  0x9c   :  { %3419 = vmatprep.mubr.f32.mxu1 %v5637_v15  ;;  %3456 = vmatpush3.msra.mxu0 %v5636_v6 }
  0x9d   :  { %3457 = vmatprep.mubr.f32.mxu0 %v4160_v56  ;;  %3504 = vmatpush3.msra.mxu1 %v4142_v48 }
  0x9e   :  { %3420 = vmatmul.mubr.f32.gmra.mxu1 %v5638_v43  ;;  %3458 = vmatmul.mubr.f32.vlgmr.msra.gmra.mxu0 %v4172_v61 }
  0x9f   :  { %3505 = vmatprep.subr.mxu1 %v4176_v62  ;;  %3422 = vmatprep.mubr.f32.mxu1 %v5639_v37 }
  0xa0   :  { %3506 = vmatpush3.msra.mxu1 %v4176_v62  ;;  %3460 = vmatprep.mubr.f32.mxu0 %v4209_v35 }
  0xa1   :  { %3507 = vmatprep.subr.mxu1 %v4194_v12  ;;  %3537 = vmatprep.subr.mxu0 %v4044_v3 }
  0xa2   :  { %3508 = vmatpush3.msra.mxu1 %v4194_v12  ;;  %3461 = vmatmul.mubr.f32.gmra.mxu0 %v4227_v51 }
  0xa3   :  { %3423 = vmatmul.mubr.f32.gmra.mxu1 %v5640_v50  ;;  %3509 = vmatprep.subr.mxu1 %v5610_v38 }
  0xa4   :  { %3510 = vmatpush3.msra.mxu1 %v5610_v38  ;;  %3463 = vmatprep.mubr.f32.mxu0 %v4255_v25 }
  0xa5   :  { %3511 = vmatprep.subr.mxu1 %v4231_v53  ;;  %3513 = vmatprep.mubr.f32.mxu1 %v4160_v56  ;;  %v5643_v56 = vld [vmem:[#allocation38_spill] sm:$0xff] }
  0xa6   :  { %3512 = vmatpush3.msra.mxu1 %v4231_v53  ;;  %3464 = vmatmul.mubr.f32.gmra.mxu0 %v4274_v58 }
  0xa7   :  { %3514 = vmatmul.mubr.f32.vlgmr.msra.gmra.mxu1 %v4172_v61  ;;  %3466 = vmatprep.mubr.f32.mxu0 %v4309_v28  ;;  %v5644_v61 = vld [vmem:[#allocation42_spill] sm:$0xff] }
  0xa8   :  { %3516 = vmatprep.mubr.f32.mxu1 %v4209_v35  ;;  %3593 = vmatprep.subr.mxu1 %v5641_v19  ;;  %v5645_v35 = vld [vmem:[#allocation45_spill] sm:$0xff] }
  0xa9   :  { %3594 = vmatpush3.msra.mxu1 %v5641_v19  ;;  %3538 = vmatpush3.msra.mxu0 %v4044_v3 }
  0xaa   :  { %3467 = vmatmul.mubr.f32.gmra.mxu0 %v4326_v23  ;;  %3595 = vmatprep.subr.mxu1 %v5642_v8 }
  0xab   :  { %3517 = vmatmul.mubr.f32.gmra.mxu1 %v4227_v51  ;;  %3469 = vmatprep.mubr.f32.mxu0 %v4353_v47  ;;  %v5651_v51 = vld [vmem:[#allocation67_spill] sm:$0xff] }
  0xac   :  { %3519 = vmatprep.mubr.f32.mxu1 %v4255_v25  ;;  %3596 = vmatpush3.msra.mxu1 %v5642_v8  ;;  %v5652_v25 = vld [vmem:[#allocation70_spill] sm:$0xff] }
  0xad   :  { %3597 = vmatprep.subr.mxu1 %v5643_v56  ;;  %3539 = vmatprep.subr.mxu0 %v4046_v4 }
  0xae   :  { %3470 = vmatmul.mubr.f32.gmra.mxu0 %v4363_v31  ;;  %3598 = vmatpush3.msra.mxu1 %v5643_v56 }
  0xaf   :  { %3520 = vmatmul.mubr.f32.gmra.mxu1 %v4274_v58  ;;  %3472 = vmatprep.mubr.f32.mxu0 %v4383_v14  ;;  %v5646_v58 = vld [vmem:[#allocation49_spill] sm:$0xff] }
  0xb0   :  { %3522 = vmatprep.mubr.f32.mxu1 %v4309_v28  ;;  %3599 = vmatprep.subr.mxu1 %v5644_v61  ;;  %v5648_v28 = vld [vmem:[#allocation57_spill] sm:$0xff] }
  0xb1   :  { %3600 = vmatpush3.msra.mxu1 %v5644_v61  ;;  %3540 = vmatpush3.msra.mxu0 %v4046_v4 }
  0xb2   :  { %3473 = vmatmul.mubr.f32.gmra.mxu0 %v4392_v17  ;;  %3601 = vmatprep.subr.mxu1 %v5645_v35 }
  0xb3   :  { %3523 = vmatmul.mubr.f32.gmra.mxu1 %v4326_v23  ;;  %3475 = vmatprep.mubr.f32.mxu0 %v4411_v18  ;;  %v5647_v23 = vld [vmem:[#allocation52_spill] sm:$0xff] }
  0xb4   :  { %3525 = vmatprep.mubr.f32.mxu1 %v4353_v47  ;;  %3602 = vmatpush3.msra.mxu1 %v5645_v35  ;;  %v5653_v47 = vld [vmem:[#allocation72_spill] sm:$0xff] }
  0xb5   :  { %3603 = vmatprep.subr.mxu1 %v5646_v58  ;;  %3541 = vmatprep.subr.mxu0 %v4048_v5 }
  0xb6   :  { %3476 = vmatmul.mubr.f32.gmra.mxu0 %v4420_v44  ;;  %3604 = vmatpush3.msra.mxu1 %v5646_v58 }
  0xb7   :  { %3526 = vmatmul.mubr.f32.gmra.mxu1 %v4363_v31  ;;  %3478 = vmatprep.mubr.f32.mxu0 %v4439_v59  ;;  %v5654_v31 = vld [vmem:[#allocation73_spill] sm:$0xff] }
  0xb8   :  { %3528 = vmatprep.mubr.f32.mxu1 %v4383_v14  ;;  %3605 = vmatprep.subr.mxu1 %v5647_v23  ;;  %v5649_v14 = vld [vmem:[#allocation61_spill] sm:$0xff] }
  0xb9   :  { %3542 = vmatpush3.msra.mxu0 %v4048_v5  ;;  %3606 = vmatpush3.msra.mxu1 %v5647_v23 }
  0xba   :  { %3479 = vmatmul.mubr.f32.gmra.mxu0 %v4448_v41  ;;  %3543 = vmatprep.subr.mxu0 %v4050_v9 }
  0xbb   :  { %3529 = vmatmul.mubr.f32.gmra.mxu1 %v4392_v17  ;;  %3607 = vmatprep.subr.mxu1 %v5648_v28  ;;  %v5650_v17 = vld [vmem:[#allocation65_spill] sm:$0xff] }
  0xbc   :  { %3531 = vmatprep.mubr.f32.mxu1 %v4411_v18  ;;  %3544 = vmatpush3.msra.mxu0 %v4050_v9  ;;  %v5657_v18 = vld [vmem:[#allocation17_spill] sm:$0xff] }
  0xbd   :  { %3608 = vmatpush3.msra.mxu1 %v5648_v28  ;;  %3545 = vmatprep.subr.mxu0 %v4052_v10 }
  0xbe   :  { %3609 = vmatprep.subr.mxu1 %v5649_v14  ;;  %3546 = vmatpush3.msra.mxu0 %v4052_v10 }
  0xbf   :  { %3532 = vmatmul.mubr.f32.gmra.mxu1 %v4420_v44  ;;  %3547 = vmatprep.subr.mxu0 %v4054_v11  ;;  %v5656_v44 = vld [vmem:[#allocation75_spill] sm:$0xff] }
  0xc0   :  { %3534 = vmatprep.mubr.f32.mxu1 %v4439_v59  ;;  %3610 = vmatpush3.msra.mxu1 %v5649_v14 }
  0xc1   :  { %3611 = vmatprep.subr.mxu1 %v5650_v17  ;;  %3548 = vmatpush3.msra.mxu0 %v4054_v11 }
  0xc2   :  { %3612 = vmatpush3.msra.mxu1 %v5650_v17  ;;  %3549 = vmatprep.subr.mxu0 %v4063_v16 }
  0xc3   :  { %3535 = vmatmul.mubr.f32.gmra.mxu1 %v4448_v41  ;;  %3613 = vmatprep.subr.mxu1 %v5651_v51  ;;  %v5655_v41 = vld [vmem:[#allocation74_spill] sm:$0xff] }
  0xc4   :  { %3550 = vmatpush3.msra.mxu0 %v4063_v16  ;;  %3614 = vmatpush3.msra.mxu1 %v5651_v51 }
  0xc5   :  { %3551 = vmatprep.subr.mxu0 %v4085_v24  ;;  %3615 = vmatprep.subr.mxu1 %v5652_v25 }
  0xc6   :  { %3552 = vmatpush3.msra.mxu0 %v4085_v24  ;;  %3616 = vmatpush3.msra.mxu1 %v5652_v25 }
  0xc7   :  { %3553 = vmatprep.subr.mxu0 %v4091_v27  ;;  %3617 = vmatprep.subr.mxu1 %v5653_v47 }
  0xc8   :  { %3554 = vmatpush3.msra.mxu0 %v4091_v27  ;;  %3618 = vmatpush3.msra.mxu1 %v5653_v47 }
  0xc9   :  { %3555 = vmatprep.subr.mxu0 %v4110_v34  ;;  %3619 = vmatprep.subr.mxu1 %v5654_v31 }
  0xca   :  { %3556 = vmatpush3.msra.mxu0 %v4110_v34  ;;  %3620 = vmatpush3.msra.mxu1 %v5654_v31 }
  0xcb   :  { %3557 = vmatprep.subr.mxu0 %v4135_v45  ;;  %3621 = vmatprep.subr.mxu1 %v5655_v41 }
  0xcc   :  { %3558 = vmatpush3.msra.mxu0 %v4135_v45  ;;  %3622 = vmatpush3.msra.mxu1 %v5655_v41 }
  0xcd   :  { %3559 = vmatprep.subr.mxu0 %v4142_v48  ;;  %3623 = vmatprep.subr.mxu1 %v5656_v44 }
  0xce   :  { %3560 = vmatpush3.msra.mxu0 %v4142_v48  ;;  %3624 = vmatpush3.msra.mxu1 %v5656_v44 }
  0xcf   :  { %3561 = vmatprep.subr.mxu0 %v4176_v62  ;;  %3705 = vmatprep.subr.mxu1 %v4044_v3 }
  0xd0   :  { %3562 = vmatpush3.msra.mxu0 %v4176_v62 }
  0xd1   :  { %3563 = vmatprep.subr.mxu0 %v4194_v12 }
  0xd2   :  { %3564 = vmatpush3.msra.mxu0 %v4194_v12 }
  0xd3   :  { %3565 = vmatprep.subr.mxu0 %v5610_v38 }
  0xd4   :  { %3566 = vmatpush3.msra.mxu0 %v5610_v38 }
  0xd5   :  { %3567 = vmatprep.subr.mxu0 %v4231_v53 }
  0xd6   :  { %3568 = vmatpush3.msra.mxu0 %v4231_v53 }
  0xd7   :  { %3649 = vmatprep.subr.mxu0 %v5657_v18 }
  0xff   :  { %v4734_v59 = vpop.f32.mrf.mxu0 }
 0x101   :  { %v4736_v29 = vpop.f32.mrf.mxu0 }
 0x105   :  { %v4738_v49 = vpop.f32.mrf.mxu0 }
 0x107   :  { %v4740_v15 = vpop.f32.mrf.mxu0 }
 0x10a   :  { %v4742_v43 = vpop.f32.mrf.mxu0  ;;  %v3291_v37 = vpop.f32.mrf.mxu1 }
 0x10b   :  { %v471_v18 = vadd.f32 %v3291_v37, %v4734_v59 }
 0x10c   :  { %v4744_v50 = vpop.f32.mrf.mxu0  ;;  %v4746_v19 = vpop.f32.mrf.mxu1 }
 0x10d   :  { %v465_v9 = vadd.f32 %v4746_v19, %v4736_v29 }
 0x110   :  { %v4748_v8 = vpop.f32.mrf.mxu0  ;;  %v3294_v56 = vpop.f32.mrf.mxu1 }
 0x111   :  { %v483_v5 = vadd.f32 %v3294_v56, %v4738_v49 }
 0x112   :  { %v4750_v61 = vpop.f32.mrf.mxu0  ;;  %v4752_v35 = vpop.f32.mrf.mxu1 }
 0x116   :  { %v4754_v58 = vpop.f32.mrf.mxu0  ;;  %v3297_v23 = vpop.f32.mrf.mxu1 }
 0x118   :  { %v4756_v28 = vpop.f32.mrf.mxu0  ;;  %v488_v14 = vpop.f32.mrf.mxu1 }
 0x11c   :  { %v3250_v17 = vpop.f32.mrf.mxu0  ;;  %v3300_v51 = vpop.f32.mrf.mxu1 }
 0x11e   :  { %v4758_v25 = vpop.f32.mrf.mxu0  ;;  %v500_v47 = vpop.f32.mrf.mxu1 }
 0x11f   :  { %v501_v37 = vadd.f32 %v500_v47, %v4750_v61 }
 0x122   :  { %v3253_v31 = vpop.f32.mrf.mxu0  ;;  %v3303_v41 = vpop.f32.mrf.mxu1 }
 0x124   :  { %v283_v44 = vpop.f32.mrf.mxu0  ;;  %v512_v6 = vpop.f32.mrf.mxu1 }
 0x128   :  { %v3256_v2 = vpop.f32.mrf.mxu0  ;;  %v3306_v55 = vpop.f32.mrf.mxu1 }
 0x129   :  { %v4760_v39 = vadd.f32 %v3306_v55, %v3250_v17 }
 0x12a   :  { %v303_v30 = vpop.f32.mrf.mxu0  ;;  %v524_v36 = vpop.f32.mrf.mxu1 }
 0x12e   :  { %v3309_v33 = vpop.f32.mrf.mxu1  ;;  %v3347_v13 = vpop.f32.mrf.mxu0 }
 0x12f   :  { %v4762_v63 = vadd.f32 %v3309_v33, %v3253_v31  ;;  %v666_v4 = vadd.f32 %v3347_v13, %v471_v18  ;;  %v513_v13 = vadd.f32 %v512_v6, %v4756_v28  ;;  %v525_v18 = vadd.f32 %v524_v36, %v4758_v25 }
 0x130   :  { %v536_v32 = vpop.f32.mrf.mxu1  ;;  %v658_v22 = vpop.f32.mrf.mxu0 }
 0x131   :  { %v4764_v26 = vadd.f32 %v536_v32, %v283_v44  ;;  %v659_v29 = vadd.f32 %v658_v22, %v465_v9 }
 0x134   :  { %v3312_v20 = vpop.f32.mrf.mxu1  ;;  %v3350_v0 = vpop.f32.mrf.mxu0 }
 0x135   :  { %v4766_v21 = vadd.f32 %v3312_v20, %v3256_v2 }
 0x136   :  { %v548_v52 = vpop.f32.mrf.mxu1  ;;  %v672_v57 = vpop.f32.mrf.mxu0 }
 0x137   :  { %v4768_v1 = vadd.f32 %v548_v52, %v303_v30 }
 0x139   :  { %5658 = vst [vmem:[#allocation62_spill] sm:$0xff] %v4768_v1  ;;  %v507_v1 = vadd.f32 %v3300_v51, %v4748_v8 }
 0x13a   :  { %v3353_v55 = vpop.f32.mrf.mxu0  ;;  %v3403_v17 = vpop.f32.mrf.mxu1 }
 0x13b   :  { %v861_v19 = vadd.f32 %v3403_v17, %v666_v4 }
 0x13c   :  { %v686_v40 = vpop.f32.mrf.mxu0  ;;  %v852_v53 = vpop.f32.mrf.mxu1 }
 0x140   :  { %v3356_v7 = vpop.f32.mrf.mxu0  ;;  %v3406_v38 = vpop.f32.mrf.mxu1  ;;  %v5664_v17 = vld [vmem:[#allocation62_spill] sm:$0xff] }
 0x141   :  { %v708_v51 = vadd.f32 %v3356_v7, %v507_v1 }
 0x142   :  { %v700_v33 = vpop.f32.mrf.mxu0  ;;  %v868_v31 = vpop.f32.mrf.mxu1 }
 0x143   :  { %v701_v61 = vadd.f32 %v700_v33, %v501_v37 }
 0x146   :  { %v3359_v60 = vpop.f32.mrf.mxu0  ;;  %v3409_v12 = vpop.f32.mrf.mxu1 }
 0x148   :  { %v714_v32 = vpop.f32.mrf.mxu0  ;;  %v884_v44 = vpop.f32.mrf.mxu1 }
 0x149   :  { %v715_v28 = vadd.f32 %v714_v32, %v513_v13 }
 0x14c   :  { %v3362_v54 = vpop.f32.mrf.mxu0  ;;  %v3412_v62 = vpop.f32.mrf.mxu1 }
 0x14e   :  { %v728_v20 = vpop.f32.mrf.mxu0  ;;  %v900_v2 = vpop.f32.mrf.mxu1 }
 0x152   :  { %v3365_v46 = vpop.f32.mrf.mxu0  ;;  %v3415_v48 = vpop.f32.mrf.mxu1 }
 0x153   :  { %v750_v1 = vadd.f32 %v3365_v46, %v4762_v63 }
 0x154   :  { %v742_v52 = vpop.f32.mrf.mxu0  ;;  %v4770_v30 = vpop.f32.mrf.mxu1 }
 0x158   :  { %v4772_v42 = vpop.f32.mrf.mxu0  ;;  %v4774_v45 = vpop.f32.mrf.mxu1 }
 0x15a   :  { %v4776_v34 = vpop.f32.mrf.mxu0  ;;  %v4778_v27 = vpop.f32.mrf.mxu1 }
 0x15b   :  { %5659 = vst [vmem:[#allocation33_spill] sm:$0xff] %v4776_v34  ;;  %5660 = vst [vmem:[#allocation34_spill] sm:$0xff] %v4778_v27  ;;  %v477_v34 = vadd.f32 %v4752_v35, %v4740_v15  ;;  %v495_v27 = vadd.f32 %v3297_v23, %v4742_v43  ;;  %v680_v15 = vadd.f32 %v3350_v0, %v483_v5 }
 0x15c   :  { %v853_v23 = vadd.f32 %v852_v53, %v659_v29  ;;  %v736_v5 = vadd.f32 %v3362_v54, %v4760_v39  ;;  %v901_v53 = vadd.f32 %v900_v2, %v701_v61 }
 0x15d   :  { %v673_v56 = vadd.f32 %v672_v57, %v477_v34  ;;  %v694_v35 = vadd.f32 %v3353_v55, %v495_v27  ;;  %v909_v34 = vadd.f32 %v3412_v62, %v708_v51  ;;  %v917_v62 = vadd.f32 %v4770_v30, %v715_v28 }
 0x15e   :  { %v4780_v24 = vpop.f32.mrf.mxu1  ;;  %v3459_v16 = vpop.f32.mrf.mxu0  ;;  %v941_v39 = vadd.f32 %v4774_v45, %v736_v5 }
 0x15f   :  { %5661 = vst [vmem:[#allocation38_spill] sm:$0xff] %v4780_v24  ;;  %v489_v24 = vadd.f32 %v488_v14, %v4744_v50  ;;  %v1098_v8 = vadd.f32 %v3459_v16, %v861_v19  ;;  %v869_v47 = vadd.f32 %v868_v31, %v673_v56  ;;  %v893_v4 = vadd.f32 %v3409_v12, %v694_v35  ;;  %v3910_v12 = vld [vmem:[#allocation2 + $0x8] sm:$0xff] }
 0x160   :  { %v4783_v11 = vpop.f32.mrf.mxu1  ;;  %v1091_v10 = vpop.f32.mrf.mxu0 }
 0x161   :  { %5662 = vst [vmem:[#allocation42_spill] sm:$0xff] %v4783_v11  ;;  %v519_v11 = vadd.f32 %v3303_v41, %v4754_v58  ;;  %v687_v50 = vadd.f32 %v686_v40, %v489_v24  ;;  %v1092_v22 = vadd.f32 %v1091_v10, %v853_v23  ;;  %v729_v24 = vadd.f32 %v728_v20, %v525_v18 }
 0x162   :  { %v3462_v3 = vpop.f32.mrf.mxu0  ;;  %v5665_v33 = vld [vmem:[#allocation33_spill] sm:$0xff]  ;;  %v5666_v2 = vld [vmem:[#allocation34_spill] sm:$0xff] }
 0x163   :  { %v4793_v59 = vpop.f32.mrf.mxu1  ;;  %v722_v9 = vadd.f32 %v3359_v60, %v519_v11  ;;  %v885_v36 = vadd.f32 %v884_v44, %v687_v50  ;;  %v743_v11 = vadd.f32 %v742_v52, %v4764_v26  ;;  %v757_v46 = vadd.f32 %v5665_v33, %v5664_v17  ;;  %v3911_v26 = vld [vmem:[#allocation2] sm:$0xff]  ;;  %v5671_v33 = vld [vmem:[#allocation12_spill] sm:$0xff] }
 0x164   :  { %5663 = vst [vmem:[#allocation45_spill] sm:$0xff] %v4793_v59  ;;  %v1103_v49 = vpop.f32.mrf.mxu0  ;;  %v877_v59 = vadd.f32 %v3406_v38, %v680_v15  ;;  %v933_v52 = vadd.f32 %v5666_v2, %v729_v24 }
 0x165   :  { %v964_v43 = vpop.f32.mrf.mxu1  ;;  %v925_v0 = vadd.f32 %v3415_v48, %v722_v9  ;;  %v1104_v60 = vadd.f32 %v1103_v49, %v869_v47  ;;  %v3912_v49 = vld [vmem:[#allocation2 + $0x18] sm:$0xff] }
 0x166   :  { %v3465_v14 = vpop.f32.mrf.mxu0  ;;  %v1110_v57 = vadd.f32 %v3462_v3, %v877_v59  ;;  %v764_v3 = vadd.f32 %v4772_v42, %v4766_v21  ;;  %v5667_v59 = vld [vmem:[#allocation38_spill] sm:$0xff]  ;;  %v4820_v50 = vadd.f32 %v964_v43, %v757_v46 }
 0x167   :  { %v3515_v58 = vpop.f32.mrf.mxu1  ;;  %v4810_v37 = vadd.f32 %v5667_v59, %v750_v1  ;;  %v1122_v21 = vadd.f32 %v3465_v14, %v893_v4  ;;  %v5672_v59 = vld [vmem:[#allocation13_spill] sm:$0xff] }
 0x168   :  { %v1275_v41 = vadd.f32 %v3515_v58, %v1098_v8  ;;  %v1115_v6 = vpop.f32.mrf.mxu0  ;;  %v5668_v30 = vld [vmem:[#allocation42_spill] sm:$0xff]  ;;  %v3913_v58 = vld [vmem:[#allocation2 + $0x10] sm:$0xff] }
 0x169   :  { %v1268_v27 = vpop.f32.mrf.mxu1  ;;  %v4813_v29 = vadd.f32 %v5668_v30, %v743_v11  ;;  %v1116_v23 = vadd.f32 %v1115_v6, %v885_v36  ;;  %v3917_v30 = vld [vmem:[#allocation2 + $0x30] sm:$0xff] }
 0x16a   :  { %v1363_v16 = vmul.f32 0.03125, %v1275_v41  ;;  %v1269_v40 = vadd.f32 %v1268_v27, %v1092_v22  ;;  %v3468_v7 = vpop.f32.mrf.mxu0 }
 0x16b   :  { %v3518_v10 = vpop.f32.mrf.mxu1  ;;  %v5669_v56 = vld [vmem:[#allocation45_spill] sm:$0xff]  ;;  %v1134_v22 = vadd.f32 %v3468_v7, %v909_v34 }
 0x16c   :  { %v1379_v38 = vsub.f32 %v3910_v12, %v1363_v16  ;;  %v1362_v25 = vmul.f32 0.03125, %v1269_v40  ;;  %v1287_v55 = vadd.f32 %v3518_v10, %v1110_v57  ;;  %v1127_v54 = vpop.f32.mrf.mxu0  ;;  %v4818_v35 = vadd.f32 %v5669_v56, %v764_v3  ;;  %v3914_v16 = vld [vmem:[#allocation2 + $0x28] sm:$0xff] }
 0x16d   :  { %v1280_v48 = vpop.f32.mrf.mxu1  ;;  %v1128_v41 = vadd.f32 %v1127_v54, %v901_v53 }
 0x16e   :  { %v1395_v63 = vmul.f32 %v1379_v38, %v1379_v38  ;;  %v1378_v31 = vsub.f32 %v3911_v26, %v1362_v25  ;;  %v1365_v32 = vmul.f32 0.03125, %v1287_v55  ;;  %v1281_v44 = vadd.f32 %v1280_v48, %v1104_v60  ;;  %v3471_v20 = vpop.f32.mrf.mxu0  ;;  %v5670_v38 = vld [vmem:[#allocation11_spill] sm:$0xff] }
 0x16f   :  { %v3521_v42 = vpop.f32.mrf.mxu1  ;;  %v1146_v36 = vadd.f32 %v3471_v20, %v925_v0  ;;  %v3915_v55 = vld [vmem:[#allocation2 + $0x20] sm:$0xff] }
 0x170   :  { %v4815_v45 = vand.u32 4294901760, %v1395_v63  ;;  %v1394_v19 = vmul.f32 %v1378_v31, %v1378_v31  ;;  %v1381_v13 = vsub.f32 %v3912_v49, %v1365_v32  ;;  %v1364_v18 = vmul.f32 0.03125, %v1281_v44  ;;  %v1139_v15 = vpop.f32.mrf.mxu0  ;;  %v3916_v44 = vld [vmem:[#allocation2 + $0x38] sm:$0xff] }
 0x171   :  { %v1299_v8 = vadd.f32 %v3521_v42, %v1122_v21  ;;  %v1292_v51 = vpop.f32.mrf.mxu1  ;;  %v1140_v1 = vadd.f32 %v1139_v15, %v917_v62 }
 0x172   :  { %v4823_v61 = vsub.f32 %v1395_v63, %v4815_v45  ;;  %v4825_v14 = vand.u32 4294901760, %v1394_v19  ;;  %v1397_v47 = vmul.f32 %v1381_v13, %v1381_v13  ;;  %v1380_v9 = vsub.f32 %v3913_v58, %v1364_v18  ;;  %v3474_v4 = vpop.f32.mrf.mxu0 }
 0x173   :  { %v1367_v28 = vmul.f32 0.03125, %v1299_v8  ;;  %v1293_v5 = vadd.f32 %v1292_v51, %v1116_v23  ;;  %v3524_v27 = vpop.f32.mrf.mxu1  ;;  %v1158_v53 = vadd.f32 %v3474_v4, %v941_v39  ;;  %v5673_v8 = vld [vmem:[#allocation14_spill] sm:$0xff] }
 0x174   :  { %v1503_v43 = vand.u32 4294901760, %v4823_v61  ;;  %v4828_v24 = vand.u32 4294901760, %v1397_v47  ;;  %v1396_v6 = vmul.f32 %v1380_v9, %v1380_v9  ;;  %3625 = vmatprep.mubr.f32.mxu1 %v4825_v14  ;;  %v1151_v57 = vpop.f32.mrf.mxu0  ;;  %v1311_v10 = vadd.f32 %v3524_v27, %v1134_v22 }
 0x175   :  { %v1383_v40 = vsub.f32 %v3914_v16, %v1367_v28  ;;  %v1366_v11 = vmul.f32 0.03125, %v1293_v5  ;;  %v1304_v60 = vpop.f32.mrf.mxu1  ;;  %3626 = vmatmul.mubr.f32.vlgmr.msra.gmra.mxu1 %v4815_v45  ;;  %v4833_v34 = vsub.f32 %v1394_v19, %v4825_v14  ;;  %v1152_v62 = vadd.f32 %v1151_v57, %v933_v52  ;;  %v5674_v5 = vld [vmem:[#allocation15_spill] sm:$0xff] }
 0x176   :  { %v4835_v7 = vand.u32 4294901760, %v1396_v6  ;;  %v1305_v12 = vadd.f32 %v1304_v60, %v1128_v41  ;;  %3706 = vmatpush3.msra.mxu1 %v5670_v38  ;;  %v3477_v0 = vpop.f32.mrf.mxu0  ;;  %v1369_v3 = vmul.f32 0.03125, %v1311_v10  ;;  %v4842_v46 = vsub.f32 %v4823_v61, %v1503_v43 }
 0x177   :  { %v1399_v25 = vmul.f32 %v1383_v40, %v1383_v40  ;;  %v1382_v54 = vsub.f32 %v3915_v55, %v1366_v11  ;;  %v3527_v17 = vpop.f32.mrf.mxu1  ;;  %3707 = vmatprep.subr.mxu1 %v5671_v33  ;;  %v4845_v48 = vsub.f32 %v1397_v47, %v4828_v24  ;;  %v1170_v2 = vadd.f32 %v3477_v0, %v4810_v37  ;;  %v3918_v47 = vld [vmem:[#allocation2 + $0x48] sm:$0xff] }
 0x178   :  { %v1368_v39 = vmul.f32 0.03125, %v1305_v12  ;;  %v1323_v63 = vadd.f32 %v3527_v17, %v1146_v36  ;;  %3628 = vmatprep.mubr.f32.mxu1 %v4835_v7  ;;  %3708 = vmatpush3.msra.mxu1 %v5671_v33  ;;  %v1163_v26 = vpop.f32.mrf.mxu0  ;;  %v1385_v20 = vsub.f32 %v3916_v44, %v1369_v3  ;;  %v1493_v13 = vand.u32 4294901760, %v4833_v34  ;;  %v3919_v36 = vld [vmem:[#allocation2 + $0x40] sm:$0xff] }
 0x179   :  { %v4849_v31 = vand.u32 4294901760, %v1399_v25  ;;  %v1398_v32 = vmul.f32 %v1382_v54, %v1382_v54  ;;  %v1316_v52 = vpop.f32.mrf.mxu1  ;;  %3629 = vmatmul.mubr.f32.gmra.mxu1 %v4828_v24  ;;  %3709 = vmatprep.subr.mxu1 %v5672_v59  ;;  %v4857_v18 = vsub.f32 %v1396_v6, %v4835_v7  ;;  %v1164_v56 = vadd.f32 %v1163_v26, %v4813_v29  ;;  %v5675_v54 = vld [vmem:[#allocation16_spill] sm:$0xff] }
 0x17a   :  { %v1384_v21 = vsub.f32 %v3917_v30, %v1368_v39  ;;  %v1371_v42 = vmul.f32 0.03125, %v1323_v63  ;;  %v1317_v19 = vadd.f32 %v1316_v52, %v1140_v1  ;;  %3710 = vmatpush3.msra.mxu1 %v5672_v59  ;;  %v3480_v49 = vpop.f32.mrf.mxu0  ;;  %v1401_v37 = vmul.f32 %v1385_v20, %v1385_v20  ;;  %v3921_v20 = vld [vmem:[#allocation2 + $0x50] sm:$0xff] }
 0x17b   :  { %v4859_v15 = vand.u32 4294901760, %v1398_v32  ;;  %v3530_v23 = vpop.f32.mrf.mxu1  ;;  %3711 = vmatprep.subr.mxu1 %v5673_v8  ;;  %v4865_v22 = vsub.f32 %v1399_v25, %v4849_v31  ;;  %v1182_v41 = vadd.f32 %v3480_v49, %v4818_v35  ;;  %v1494_v28 = vsub.f32 %v4833_v34, %v1493_v13  ;;  %v3920_v25 = vld [vmem:[#allocation2 + $0x58] sm:$0xff]  ;;  %v5676_v52 = vld [vmem:[#allocation17_spill] sm:$0xff] }
 0x17c   :  { %v1400_v51 = vmul.f32 %v1384_v21, %v1384_v21  ;;  %v1387_v58 = vsub.f32 %v3918_v47, %v1371_v42  ;;  %v1370_v9 = vmul.f32 0.03125, %v1317_v19  ;;  %v1335_v4 = vadd.f32 %v3530_v23, %v1158_v53  ;;  %3712 = vmatpush3.msra.mxu1 %v5673_v8  ;;  %v1175_v1 = vpop.f32.mrf.mxu0  ;;  %v5677_v42 = vld [vmem:[#allocation19_spill] sm:$0xff] }
 0x17d   :  { %3631 = vmatprep.mubr.f32.mxu1 %v4859_v15  ;;  %v1328_v29 = vpop.f32.mrf.mxu1  ;;  %3713 = vmatprep.subr.mxu1 %v5674_v5  ;;  %v4873_v27 = vand.u32 4294901760, %v1401_v37  ;;  %v4879_v35 = vsub.f32 %v1398_v32, %v4859_v15  ;;  %v1495_v40 = vand.u32 4294901760, %v1494_v28  ;;  %v1513_v60 = vand.u32 4294901760, %v4857_v18 }
 0x17e   :  { %v4875_v6 = vand.u32 4294901760, %v1400_v51  ;;  %v1386_v57 = vsub.f32 %v3919_v36, %v1370_v9  ;;  %v1373_v16 = vmul.f32 0.03125, %v1335_v4  ;;  %3632 = vmatmul.mubr.f32.gmra.mxu1 %v4849_v31  ;;  %v1329_v11 = vadd.f32 %v1328_v29, %v1152_v62  ;;  %v3922_v29 = vld [vmem:[#allocation2 + $0x60] sm:$0xff]  ;;  %v5679_v36 = vld [vmem:[#allocation20_spill] sm:$0xff] }
 0x17f   :  { %3714 = vmatpush3.msra.mxu1 %v5674_v5  ;;  %v3533_v10 = vpop.f32.mrf.mxu1  ;;  %v1505_v53 = vand.u32 4294901760, %v4842_v46  ;;  %v1403_v12 = vmul.f32 %v1387_v58, %v1387_v58  ;;  %3569 = vmatprep.mubr.f32.mxu0 %v1495_v40  ;;  %v1514_v62 = vsub.f32 %v4857_v18, %v1513_v60  ;;  %v1523_v46 = vand.u32 4294901760, %v4845_v48 }
 0x180   :  { %v1402_v0 = vmul.f32 %v1386_v57, %v1386_v57  ;;  %v1389_v55 = vsub.f32 %v3920_v25, %v1373_v16  ;;  %3715 = vmatprep.subr.mxu1 %v5675_v54  ;;  %3634 = vmatprep.mubr.f32.mxu1 %v4875_v6  ;;  %v1372_v3 = vmul.f32 0.03125, %v1329_v11  ;;  %v1347_v17 = vadd.f32 %v3533_v10, %v1170_v2  ;;  %v5680_v16 = vld [vmem:[#allocation26_spill] sm:$0xff]  ;;  %v3923_v25 = vld [vmem:[#allocation2 + $0x68] sm:$0xff] }
 0x181   :  { %3716 = vmatpush3.msra.mxu1 %v5675_v54  ;;  %v1340_v39 = vpop.f32.mrf.mxu1  ;;  %v4892_v63 = vsub.f32 %v1401_v37, %v4873_v27  ;;  %v1176_v26 = vadd.f32 %v1175_v1, %v4820_v50  ;;  %3570 = vmatmul.mubr.f32.vlgmr.msra.gmra.mxu0 %v1505_v53  ;;  %v1515_v30 = vand.u32 4294901760, %v1514_v62  ;;  %v1524_v21 = vsub.f32 %v4845_v48, %v1523_v46  ;;  %v5681_v62 = vld [vmem:[#allocation21_spill] sm:$0xff] }
 0x182   :  { %v1341_v32 = vadd.f32 %v1340_v39, %v1164_v56  ;;  %3635 = vmatmul.mubr.f32.gmra.mxu1 %v4873_v27  ;;  %v4896_v44 = vand.u32 4294901760, %v1402_v0  ;;  %v1388_v2 = vsub.f32 %v3921_v20, %v1372_v3  ;;  %3650 = vmatpush3.msra.mxu0 %v5676_v52  ;;  %v4904_v50 = vsub.f32 %v1400_v51, %v4875_v6  ;;  %v5678_v56 = vld [vmem:[#allocation18_spill] sm:$0xff] }
 0x183   :  { %3717 = vmatprep.subr.mxu1 %v5677_v42  ;;  %v3536_v19 = vpop.f32.mrf.mxu1  ;;  %v4906_v49 = vand.u32 4294901760, %v1403_v12  ;;  %v1375_v37 = vmul.f32 0.03125, %v1347_v17  ;;  %3651 = vmatprep.subr.mxu0 %v5678_v56  ;;  %v1405_v47 = vmul.f32 %v1389_v55, %v1389_v55  ;;  %v1525_v9 = vand.u32 4294901760, %v1524_v21 }
 0x184   :  { %v1374_v23 = vmul.f32 0.03125, %v1341_v32  ;;  %3718 = vmatpush3.msra.mxu1 %v5677_v42  ;;  %v1404_v58 = vmul.f32 %v1388_v2, %v1388_v2  ;;  %3572 = vmatprep.mubr.f32.mxu0 %v1515_v30  ;;  %v1533_v4 = vand.u32 4294901760, %v4879_v35  ;;  %v1359_v57 = vadd.f32 %v3536_v19, %v1182_v41  ;;  %v3924_v30 = vld [vmem:[#allocation2 + $0x70] sm:$0xff] }
 0x185   :  { %3652 = vmatpush3.msra.mxu0 %v5678_v56  ;;  %v1352_v28 = vpop.f32.mrf.mxu1  ;;  %3719 = vmatprep.subr.mxu1 %v5680_v16  ;;  %v4915_v1 = vsub.f32 %v1402_v0, %v4896_v44  ;;  %v1543_v53 = vand.u32 4294901760, %v4865_v22  ;;  %v1391_v55 = vsub.f32 %v3923_v25, %v1375_v37  ;;  %v1553_v0 = vand.u32 4294901760, %v4904_v50  ;;  %v5683_v37 = vld [vmem:[#allocation22_spill] sm:$0xff] }
 0x186   :  { %v1390_v51 = vsub.f32 %v3922_v29, %v1374_v23  ;;  %3653 = vmatprep.subr.mxu0 %v5679_v36  ;;  %v1353_v40 = vadd.f32 %v1352_v28, %v1176_v26  ;;  %v4917_v11 = vand.u32 4294901760, %v1404_v58  ;;  %3573 = vmatmul.mubr.f32.gmra.mxu0 %v1525_v9  ;;  %v1534_v10 = vsub.f32 %v4879_v35, %v1533_v4  ;;  %v5684_v29 = vld [vmem:[#allocation30_spill] sm:$0xff] }
 0x187   :  { %3637 = vmatprep.mubr.f32.mxu1 %v4896_v44  ;;  %3654 = vmatpush3.msra.mxu0 %v5679_v36  ;;  %v4928_v3 = vsub.f32 %v1403_v12, %v4906_v49  ;;  %v1544_v26 = vsub.f32 %v4865_v22, %v1543_v53  ;;  %v4935_v32 = vand.u32 4294901760, %v1405_v47  ;;  %v1377_v2 = vmul.f32 0.03125, %v1359_v57  ;;  %v5682_v12 = vld [vmem:[#allocation28_spill] sm:$0xff] }
 0x188   :  { %3720 = vmatpush3.msra.mxu1 %v5680_v16  ;;  %v1376_v41 = vmul.f32 0.03125, %v1353_v40  ;;  %v1406_v17 = vmul.f32 %v1390_v51, %v1390_v51  ;;  %3655 = vmatprep.subr.mxu0 %v5681_v62  ;;  %v1535_v39 = vand.u32 4294901760, %v1534_v10  ;;  %v4938_v20 = vsub.f32 %v1404_v58, %v4917_v11  ;;  %v4963_v10 = vld [vmem:[#allocation2 + $0x78] sm:$0xff] }
 0x189   :  { %3638 = vmatmul.mubr.f32.gmra.mxu1 %v4906_v49  ;;  %3656 = vmatpush3.msra.mxu0 %v5681_v62  ;;  %v1554_v52 = vsub.f32 %v4904_v50, %v1553_v0  ;;  %v1545_v19 = vand.u32 4294901760, %v1544_v26  ;;  %v5528_v56 = vand.u32 4294901760, %v4892_v63  ;;  %v5526_v23 = vand.u32 4294901760, %v4915_v1  ;;  %5685 = vst [vmem:[#allocation49_spill] sm:$0xff] %v4963_v10 }
 0x18a   :  { %3721 = vmatprep.subr.mxu1 %v5682_v12  ;;  %3575 = vmatprep.mubr.f32.mxu0 %v1535_v39  ;;  %v1392_v21 = vsub.f32 %v3924_v30, %v1376_v41  ;;  %v1407_v58 = vmul.f32 %v1391_v55, %v1391_v55  ;;  %v4950_v28 = vand.u32 4294901760, %v1406_v17  ;;  %v5524_v57 = vand.u32 4294901760, %v4928_v3  ;;  %v5686_v55 = vld [vmem:[#allocation32_spill] sm:$0xff] }
 0x18b   :  { %3657 = vmatprep.subr.mxu0 %v5683_v37  ;;  %3722 = vmatpush3.msra.mxu1 %v5682_v12  ;;  %v1555_v9 = vand.u32 4294901760, %v1554_v52  ;;  %v1564_v51 = vsub.f32 %v4892_v63, %v5528_v56  ;;  %v1574_v36 = vsub.f32 %v4915_v1, %v5526_v23  ;;  %v4961_v40 = vsub.f32 %v1405_v47, %v4935_v32  ;;  %v5687_v47 = vld [vmem:[#allocation31_spill] sm:$0xff] }
 0x18c   :  { %3658 = vmatpush3.msra.mxu0 %v5683_v37  ;;  %v1393_v25 = vsub.f32 %v4963_v10, %v1377_v2  ;;  %3723 = vmatprep.subr.mxu1 %v5686_v55  ;;  %v5523_v41 = vand.u32 4294901760, %v4938_v20  ;;  %v1408_v62 = vmul.f32 %v1392_v21, %v1392_v21  ;;  %v4970_v26 = vand.u32 4294901760, %v1407_v58 }
 0x18d   :  { %3576 = vmatmul.mubr.f32.gmra.mxu0 %v1545_v19  ;;  %3659 = vmatprep.subr.mxu0 %v5684_v29  ;;  %v1565_v39 = vand.u32 4294901760, %v1564_v51  ;;  %v1575_v52 = vand.u32 4294901760, %v1574_v36  ;;  %v1584_v2 = vsub.f32 %v4928_v3, %v5524_v57  ;;  %v4978_v30 = vsub.f32 %v1406_v17, %v4950_v28  ;;  %v5688_v19 = vld [vmem:[#allocation39_spill] sm:$0xff]  ;;  %v5689_v17 = vld [vmem:[#allocation37_spill] sm:$0xff] }
 0x18e   :  { %3578 = vmatprep.mubr.f32.mxu0 %v1555_v9  ;;  %3640 = vmatprep.mubr.f32.mxu1 %v4917_v11  ;;  %v1409_v21 = vmul.f32 %v1393_v25, %v1393_v25  ;;  %v1594_v37 = vsub.f32 %v4938_v20, %v5523_v41  ;;  %v5525_v9 = vand.u32 4294901760, %v4961_v40  ;;  %v4992_v51 = vsub.f32 %v1407_v58, %v4970_v26  ;;  %v5690_v36 = vld [vmem:[#allocation41_spill] sm:$0xff] }
 0x18f   :  { %3660 = vmatpush3.msra.mxu0 %v5684_v29  ;;  %3724 = vmatpush3.msra.mxu1 %v5686_v55  ;;  %v4987_v29 = vand.u32 4294901760, %v1408_v62  ;;  %v1585_v25 = vand.u32 4294901760, %v1584_v2  ;;  %v5692_v2 = vld [vmem:[#allocation48_spill] sm:$0xff] }
 0x190   :  { %3661 = vmatprep.subr.mxu0 %v5687_v47  ;;  %3641 = vmatmul.mubr.f32.gmra.mxu1 %v4935_v32  ;;  %v1595_v41 = vand.u32 4294901760, %v1594_v37  ;;  %v1604_v58 = vsub.f32 %v4961_v40, %v5525_v9  ;;  %v5693_v37 = vld [vmem:[#allocation44_spill] sm:$0xff]  ;;  %v5694_v9 = vld [vmem:[#allocation53_spill] sm:$0xff] }
 0x191   :  { %3579 = vmatmul.mubr.f32.gmra.mxu0 %v1565_v39  ;;  %3725 = vmatprep.subr.mxu1 %v5688_v19  ;;  %v5527_v39 = vand.u32 4294901760, %v4978_v30  ;;  %v5005_v57 = vsub.f32 %v1408_v62, %v4987_v29 }
 0x192   :  { %3662 = vmatpush3.msra.mxu0 %v5687_v47  ;;  %3726 = vmatpush3.msra.mxu1 %v5688_v19  ;;  %v4998_v47 = vand.u32 4294901760, %v1409_v21  ;;  %v1605_v23 = vand.u32 4294901760, %v1604_v58 }
 0x193   :  { %3663 = vmatprep.subr.mxu0 %v5689_v17  ;;  %3727 = vmatprep.subr.mxu1 %v5690_v36 }
 0x194   :  { %3581 = vmatprep.mubr.f32.mxu0 %v1575_v52  ;;  %3643 = vmatprep.mubr.f32.mxu1 %v4950_v28  ;;  %v5691_v52 = vld [vmem:[#allocation40_spill] sm:$0xff]  ;;  %v5018_v62 = vsub.f32 %v1409_v21, %v4998_v47  ;;  %v5695_v21 = vld [vmem:[#allocation47_spill] sm:$0xff] }
 0x195   :  { %3664 = vmatpush3.msra.mxu0 %v5689_v17  ;;  %3728 = vmatpush3.msra.mxu1 %v5690_v36  ;;  %v5529_v17 = vand.u32 4294901760, %v4992_v51 }
 0x196   :  { %3582 = vmatmul.mubr.f32.gmra.mxu0 %v1585_v25  ;;  %3644 = vmatmul.mubr.f32.gmra.mxu1 %v4970_v26  ;;  %v1614_v25 = vsub.f32 %v4978_v30, %v5527_v39  ;;  %v1643_v58 = vand.u32 4294901760, %v5018_v62 }
 0x197   :  { %3665 = vmatprep.subr.mxu0 %v5691_v52  ;;  %3729 = vmatprep.subr.mxu1 %v5692_v2  ;;  %v1624_v39 = vsub.f32 %v4992_v51, %v5529_v17  ;;  %v5698_v17 = vld [vmem:[#allocation59_spill] sm:$0xff] }
 0x198   :  { %3666 = vmatpush3.msra.mxu0 %v5691_v52  ;;  %3730 = vmatpush3.msra.mxu1 %v5692_v2  ;;  %v5530_v52 = vand.u32 4294901760, %v5005_v57  ;;  %v1615_v56 = vand.u32 4294901760, %v1614_v25 }
 0x199   :  { %3667 = vmatprep.subr.mxu0 %v5693_v37  ;;  %3731 = vmatprep.subr.mxu1 %v5694_v9  ;;  %v1625_v25 = vand.u32 4294901760, %v1624_v39 }
 0x19a   :  { %3584 = vmatprep.mubr.f32.mxu0 %v1595_v41  ;;  %3646 = vmatprep.mubr.f32.mxu1 %v4987_v29  ;;  %v5696_v41 = vld [vmem:[#allocation55_spill] sm:$0xff] }
 0x19b   :  { %3668 = vmatpush3.msra.mxu0 %v5693_v37  ;;  %3732 = vmatpush3.msra.mxu1 %v5694_v9  ;;  %v5697_v37 = vld [vmem:[#allocation51_spill] sm:$0xff] }
 0x19c   :  { %3585 = vmatmul.mubr.f32.gmra.mxu0 %v1605_v23  ;;  %3647 = vmatmul.mubr.f32.gmra.mxu1 %v4998_v47  ;;  %v1634_v23 = vsub.f32 %v5005_v57, %v5530_v52 }
 0x19d   :  { %3669 = vmatprep.subr.mxu0 %v5695_v21  ;;  %3733 = vmatprep.subr.mxu1 %v5696_v41 }
 0x19e   :  { %3670 = vmatpush3.msra.mxu0 %v5695_v21  ;;  %3734 = vmatpush3.msra.mxu1 %v5696_v41  ;;  %v1644_v21 = vsub.f32 %v5018_v62, %v1643_v58  ;;  %v1635_v52 = vand.u32 4294901760, %v1634_v23 }
 0x19f   :  { %3737 = vmatprep.mubr.f32.mxu1 %v1493_v13  ;;  %3671 = vmatprep.subr.mxu0 %v5697_v37  ;;  %v5699_v13 = vld [vmem:[#allocation56_spill] sm:$0xff] }
 0x1a0   :  { %3735 = vmatprep.subr.mxu1 %v5698_v17  ;;  %3587 = vmatprep.mubr.f32.mxu0 %v1615_v56  ;;  %v5700_v56 = vld [vmem:[#allocation60_spill] sm:$0xff]  ;;  %v1645_v39 = vand.u32 4294901760, %v1644_v21 }
 0x1a1   :  { %3672 = vmatpush3.msra.mxu0 %v5697_v37  ;;  %3736 = vmatpush3.msra.mxu1 %v5698_v17 }
 0x1a2   :  { %3588 = vmatmul.mubr.f32.gmra.mxu0 %v1625_v25  ;;  %3673 = vmatprep.subr.mxu0 %v5699_v13 }
 0x1a3   :  { %3738 = vmatmul.mubr.f32.vlgmr.msra.gmra.mxu1 %v1503_v43  ;;  %3817 = vmatprep.subr.mxu1 %v5670_v38  ;;  %v5701_v43 = vld [vmem:[#allocation64_spill] sm:$0xff] }
 0x1a4   :  { %3674 = vmatpush3.msra.mxu0 %v5699_v13  ;;  %3740 = vmatprep.mubr.f32.mxu1 %v1513_v60  ;;  %v5712_v60 = vld [vmem:[#allocation35_spill] sm:$0xff] }
 0x1a5   :  { %3818 = vmatpush3.msra.mxu1 %v5670_v38  ;;  %3675 = vmatprep.subr.mxu0 %v5700_v56  ;;  %v5702_v38 = vld [vmem:[#allocation68_spill] sm:$0xff] }
 0x1a6   :  { %3819 = vmatprep.subr.mxu1 %v5671_v33  ;;  %3590 = vmatprep.mubr.f32.mxu0 %v1635_v52 }
 0x1a7   :  { %3676 = vmatpush3.msra.mxu0 %v5700_v56  ;;  %3820 = vmatpush3.msra.mxu1 %v5671_v33  ;;  %v5703_v33 = vld [vmem:[#allocation23_spill] sm:$0xff] }
 0x1a8   :  { %3591 = vmatmul.mubr.f32.gmra.mxu0 %v1645_v39  ;;  %3677 = vmatprep.subr.mxu0 %v5701_v43 }
 0x1a9   :  { %3741 = vmatmul.mubr.f32.gmra.mxu1 %v1523_v46  ;;  %3821 = vmatprep.subr.mxu1 %v5672_v59  ;;  %v5715_v46 = vand.u32 4294901760, %v4978_v30 }
 0x1aa   :  { %3678 = vmatpush3.msra.mxu0 %v5701_v43  ;;  %3681 = vmatprep.mubr.f32.mxu0 %v4833_v34  ;;  %v5704_v34 = vld [vmem:[#allocation24_spill] sm:$0xff] }
 0x1ab   :  { %3743 = vmatprep.mubr.f32.mxu1 %v1533_v4  ;;  %3822 = vmatpush3.msra.mxu1 %v5672_v59  ;;  %v5706_v59 = vld [vmem:[#allocation25_spill] sm:$0xff]  ;;  %v5719_v4 = vand.u32 4294901760, %v5005_v57 }
 0x1ac   :  { %3679 = vmatprep.subr.mxu0 %v5702_v38  ;;  %3823 = vmatprep.subr.mxu1 %v5673_v8 }
 0x1ad   :  { %3680 = vmatpush3.msra.mxu0 %v5702_v38  ;;  %3824 = vmatpush3.msra.mxu1 %v5673_v8  ;;  %v5708_v8 = vld [vmem:[#allocation27_spill] sm:$0xff] }
 0x1ae   :  { %3682 = vmatmul.mubr.f32.vlgmr.msra.gmra.mxu0 %v4823_v61  ;;  %3744 = vmatmul.mubr.f32.gmra.mxu1 %v1543_v53  ;;  %v5705_v61 = vand.u32 4294901760, %v4892_v63  ;;  %v5722_v53 = vld [vmem:[#allocation58_spill] sm:$0xff] }
 0x1af   :  { %3761 = vmatprep.subr.mxu0 %v5703_v33  ;;  %3825 = vmatprep.subr.mxu1 %v5674_v5 }
 0x1b0   :  { %3684 = vmatprep.mubr.f32.mxu0 %v4857_v18  ;;  %3746 = vmatprep.mubr.f32.mxu1 %v1553_v0  ;;  %v5707_v18 = vand.u32 4294901760, %v4915_v1  ;;  %v5723_v0 = vld [vmem:[#allocation63_spill] sm:$0xff] }
 0x1b1   :  { %3762 = vmatpush3.msra.mxu0 %v5703_v33  ;;  %3826 = vmatpush3.msra.mxu1 %v5674_v5  ;;  %v5710_v5 = vld [vmem:[#allocation29_spill] sm:$0xff] }
 0x1b2   :  { %3763 = vmatprep.subr.mxu0 %v5704_v34  ;;  %3827 = vmatprep.subr.mxu1 %v5675_v54 }
 0x1b3   :  { %3764 = vmatpush3.msra.mxu0 %v5704_v34  ;;  %3828 = vmatpush3.msra.mxu1 %v5675_v54  ;;  %v5714_v54 = vld [vmem:[#allocation36_spill] sm:$0xff] }
 0x1b4   :  { %3685 = vmatmul.mubr.f32.gmra.mxu0 %v4845_v48  ;;  %3747 = vmatmul.mubr.f32.gmra.mxu1 %v5705_v61  ;;  %v5709_v48 = vand.u32 4294901760, %v4928_v3 }
 0x1b5   :  { %3765 = vmatprep.subr.mxu0 %v5706_v59  ;;  %3829 = vmatprep.subr.mxu1 %v5677_v42 }
 0x1b6   :  { %3687 = vmatprep.mubr.f32.mxu0 %v4879_v35  ;;  %3749 = vmatprep.mubr.f32.mxu1 %v5707_v18  ;;  %v5711_v35 = vand.u32 4294901760, %v4938_v20 }
 0x1b7   :  { %3766 = vmatpush3.msra.mxu0 %v5706_v59  ;;  %3830 = vmatpush3.msra.mxu1 %v5677_v42  ;;  %v5716_v42 = vld [vmem:[#allocation43_spill] sm:$0xff] }
 0x1b8   :  { %3767 = vmatprep.subr.mxu0 %v5708_v8  ;;  %3831 = vmatprep.subr.mxu1 %v5680_v16 }
 0x1b9   :  { %3768 = vmatpush3.msra.mxu0 %v5708_v8  ;;  %3832 = vmatpush3.msra.mxu1 %v5680_v16  ;;  %v5720_v16 = vld [vmem:[#allocation50_spill] sm:$0xff] }
 0x1ba   :  { %3688 = vmatmul.mubr.f32.gmra.mxu0 %v4865_v22  ;;  %3750 = vmatmul.mubr.f32.gmra.mxu1 %v5709_v48  ;;  %v5713_v22 = vand.u32 4294901760, %v4961_v40 }
 0x1bb   :  { %3769 = vmatprep.subr.mxu0 %v5710_v5  ;;  %3833 = vmatprep.subr.mxu1 %v5682_v12 }
 0x1bc   :  { %3690 = vmatprep.mubr.f32.mxu0 %v4904_v50  ;;  %3752 = vmatprep.mubr.f32.mxu1 %v5711_v35  ;;  %v5718_v50 = vld [vmem:[#allocation46_spill] sm:$0xff] }
 0x1bd   :  { %3770 = vmatpush3.msra.mxu0 %v5710_v5  ;;  %3834 = vmatpush3.msra.mxu1 %v5682_v12  ;;  %v5726_v12 = vld [vmem:[#allocation71_spill] sm:$0xff] }
 0x1be   :  { %3771 = vmatprep.subr.mxu0 %v5712_v60  ;;  %3835 = vmatprep.subr.mxu1 %v5686_v55 }
 0x1bf   :  { %3772 = vmatpush3.msra.mxu0 %v5712_v60  ;;  %3836 = vmatpush3.msra.mxu1 %v5686_v55 }
 0x1c0   :  { %3691 = vmatmul.mubr.f32.gmra.mxu0 %v4892_v63  ;;  %3753 = vmatmul.mubr.f32.gmra.mxu1 %v5713_v22  ;;  %v5717_v63 = vand.u32 4294901760, %v4992_v51 }
 0x1c1   :  { %3773 = vmatprep.subr.mxu0 %v5714_v54  ;;  %3837 = vmatprep.subr.mxu1 %v5688_v19 }
 0x1c2   :  { %3693 = vmatprep.mubr.f32.mxu0 %v4915_v1  ;;  %3755 = vmatprep.mubr.f32.mxu1 %v5715_v46  ;;  %v5721_v1 = vld [vmem:[#allocation54_spill] sm:$0xff] }
 0x1c3   :  { %3774 = vmatpush3.msra.mxu0 %v5714_v54  ;;  %3838 = vmatpush3.msra.mxu1 %v5688_v19 }
 0x1c4   :  { %3775 = vmatprep.subr.mxu0 %v5716_v42  ;;  %3839 = vmatprep.subr.mxu1 %v5690_v36 }
 0x1c5   :  { %3776 = vmatpush3.msra.mxu0 %v5716_v42  ;;  %3840 = vmatpush3.msra.mxu1 %v5690_v36 }
 0x1c6   :  { %3694 = vmatmul.mubr.f32.gmra.mxu0 %v4928_v3  ;;  %3756 = vmatmul.mubr.f32.gmra.mxu1 %v5717_v63  ;;  %v5724_v3 = vld [vmem:[#allocation66_spill] sm:$0xff] }
 0x1c7   :  { %3777 = vmatprep.subr.mxu0 %v5718_v50  ;;  %3841 = vmatprep.subr.mxu1 %v5692_v2 }
 0x1c8   :  { %3696 = vmatprep.mubr.f32.mxu0 %v4938_v20  ;;  %3758 = vmatprep.mubr.f32.mxu1 %v5719_v4  ;;  %v5725_v20 = vld [vmem:[#allocation69_spill] sm:$0xff] }
 0x1c9   :  { %3778 = vmatpush3.msra.mxu0 %v5718_v50  ;;  %3842 = vmatpush3.msra.mxu1 %v5692_v2 }
 0x1ca   :  { %3779 = vmatprep.subr.mxu0 %v5720_v16  ;;  %3843 = vmatprep.subr.mxu1 %v5694_v9 }
 0x1cb   :  { %3780 = vmatpush3.msra.mxu0 %v5720_v16  ;;  %3844 = vmatpush3.msra.mxu1 %v5694_v9 }
 0x1cc   :  { %3697 = vmatmul.mubr.f32.gmra.mxu0 %v4961_v40  ;;  %3759 = vmatmul.mubr.f32.gmra.mxu1 %v1643_v58 }
 0x1cd   :  { %3781 = vmatprep.subr.mxu0 %v5721_v1  ;;  %3845 = vmatprep.subr.mxu1 %v5696_v41 }
 0x1ce   :  { %3699 = vmatprep.mubr.f32.mxu0 %v4978_v30  ;;  %3782 = vmatpush3.msra.mxu0 %v5721_v1 }
 0x1cf   :  { %3846 = vmatpush3.msra.mxu1 %v5696_v41  ;;  %3849 = vmatprep.mubr.f32.mxu1 %v4825_v14 }
 0x1d0   :  { %3783 = vmatprep.subr.mxu0 %v5722_v53  ;;  %3847 = vmatprep.subr.mxu1 %v5698_v17 }
 0x1d1   :  { %3784 = vmatpush3.msra.mxu0 %v5722_v53  ;;  %3848 = vmatpush3.msra.mxu1 %v5698_v17 }
 0x1d2   :  { %3700 = vmatmul.mubr.f32.gmra.mxu0 %v4992_v51  ;;  %3785 = vmatprep.subr.mxu0 %v5723_v0 }
 0x1d3   :  { %3850 = vmatmul.mubr.f32.vlgmr.msra.gmra.mxu1 %v4815_v45  ;;  %3702 = vmatprep.mubr.f32.mxu0 %v5005_v57 }
 0x1d4   :  { %3786 = vmatpush3.msra.mxu0 %v5723_v0  ;;  %3852 = vmatprep.mubr.f32.mxu1 %v4835_v7 }
 0x1d5   :  { %3787 = vmatprep.subr.mxu0 %v5724_v3 }
 0x1d6   :  { %3788 = vmatpush3.msra.mxu0 %v5724_v3 }
 0x1d7   :  { %3703 = vmatmul.mubr.f32.gmra.mxu0 %v5018_v62  ;;  %3789 = vmatprep.subr.mxu0 %v5725_v20 }
 0x1d8   :  { %3853 = vmatmul.mubr.f32.gmra.mxu1 %v4828_v24  ;;  %3790 = vmatpush3.msra.mxu0 %v5725_v20 }
 0x1d9   :  { %3793 = vmatprep.mubr.f32.mxu0 %v4825_v14  ;;  %3855 = vmatprep.mubr.f32.mxu1 %v4859_v15 }
 0x1da   :  { %3791 = vmatprep.subr.mxu0 %v5726_v12 }
 0x1db   :  { %3792 = vmatpush3.msra.mxu0 %v5726_v12 }
 0x1dc   :  { %3794 = vmatmul.mubr.f32.vlgmr.msra.gmra.mxu0 %v4815_v45  ;;  %3856 = vmatmul.mubr.f32.gmra.mxu1 %v4849_v31 }
 0x1dd   :  { %3796 = vmatprep.mubr.f32.mxu0 %v4835_v7  ;;  %3858 = vmatprep.mubr.f32.mxu1 %v4875_v6 }
 0x1e0   :  { %3797 = vmatmul.mubr.f32.gmra.mxu0 %v4828_v24  ;;  %3859 = vmatmul.mubr.f32.gmra.mxu1 %v4873_v27 }
 0x1e1   :  { %3799 = vmatprep.mubr.f32.mxu0 %v4859_v15  ;;  %3861 = vmatprep.mubr.f32.mxu1 %v4896_v44 }
 0x1e4   :  { %3800 = vmatmul.mubr.f32.gmra.mxu0 %v4849_v31  ;;  %3862 = vmatmul.mubr.f32.gmra.mxu1 %v4906_v49 }
 0x1e5   :  { %3802 = vmatprep.mubr.f32.mxu0 %v4875_v6  ;;  %3864 = vmatprep.mubr.f32.mxu1 %v4917_v11 }
 0x1e8   :  { %3803 = vmatmul.mubr.f32.gmra.mxu0 %v4873_v27  ;;  %3865 = vmatmul.mubr.f32.gmra.mxu1 %v4935_v32 }
 0x1e9   :  { %3805 = vmatprep.mubr.f32.mxu0 %v4896_v44  ;;  %3867 = vmatprep.mubr.f32.mxu1 %v4950_v28 }
 0x1ec   :  { %3806 = vmatmul.mubr.f32.gmra.mxu0 %v4906_v49  ;;  %3868 = vmatmul.mubr.f32.gmra.mxu1 %v4970_v26 }
 0x1ed   :  { %3808 = vmatprep.mubr.f32.mxu0 %v4917_v11  ;;  %3870 = vmatprep.mubr.f32.mxu1 %v4987_v29 }
 0x1f0   :  { %3809 = vmatmul.mubr.f32.gmra.mxu0 %v4935_v32  ;;  %3871 = vmatmul.mubr.f32.gmra.mxu1 %v4998_v47 }
 0x1f1   :  { %3811 = vmatprep.mubr.f32.mxu0 %v4950_v28 }
 0x1f4   :  { %3812 = vmatmul.mubr.f32.gmra.mxu0 %v4970_v26 }
 0x1f5   :  { %3814 = vmatprep.mubr.f32.mxu0 %v4987_v29 }
 0x1f8   :  { %3815 = vmatmul.mubr.f32.gmra.mxu0 %v4998_v47 }
 0x235   :  { %v5196_v45 = vpop.f32.mrf.mxu1 }
 0x237   :  { %v5198_v14 = vpop.f32.mrf.mxu1 }
 0x239   :  { %v5200_v24 = vpop.f32.mrf.mxu1 }
 0x23b   :  { %v5202_v7 = vpop.f32.mrf.mxu1 }
 0x23e   :  { %v5204_v31 = vpop.f32.mrf.mxu1 }
 0x240   :  { %v5206_v15 = vpop.f32.mrf.mxu1 }
 0x241   :  { %v3571_v27 = vpop.f32.mrf.mxu0 }
 0x242   :  { %v5208_v6 = vpop.f32.mrf.mxu1  ;;  %v1805_v10 = vadd.f32 %v5196_v45, %v3571_v27 }
 0x243   :  { %v1497_v44 = vpop.f32.mrf.mxu0 }
 0x244   :  { %v5210_v49 = vpop.f32.mrf.mxu1 }
 0x246   :  { %v3574_v11 = vpop.f32.mrf.mxu0 }
 0x248   :  { %v1517_v32 = vpop.f32.mrf.mxu0 }
 0x249   :  { %v5212_v28 = vpop.f32.mrf.mxu1 }
 0x24b   :  { %v5216_v40 = vpop.f32.mrf.mxu1 }
 0x24d   :  { %v5214_v57 = vpop.f32.mrf.mxu0 }
 0x24f   :  { %v5218_v55 = vpop.f32.mrf.mxu0 }
 0x250   :  { %v5222_v30 = vpop.f32.mrf.mxu1 }
 0x251   :  { %v5220_v26 = vpop.f32.mrf.mxu0 }
 0x252   :  { %v5226_v9 = vpop.f32.mrf.mxu1 }
 0x253   :  { %v5224_v19 = vpop.f32.mrf.mxu0 }
 0x256   :  { %v5228_v29 = vpop.f32.mrf.mxu0  ;;  %v5230_v51 = vpop.f32.mrf.mxu1 }
 0x258   :  { %v5232_v36 = vpop.f32.mrf.mxu0  ;;  %v5234_v47 = vpop.f32.mrf.mxu1 }
 0x259   :  { %5727 = vst [vmem:[#allocation52_spill] sm:$0xff] %v5234_v47 }
 0x25c   :  { %v5236_v2 = vpop.f32.mrf.mxu0  ;;  %v5238_v17 = vpop.f32.mrf.mxu1 }
 0x25d   :  { %5728 = vst [vmem:[#allocation57_spill] sm:$0xff] %v5238_v17 }
 0x25e   :  { %v5240_v62 = vpop.f32.mrf.mxu0  ;;  %v5242_v52 = vpop.f32.mrf.mxu1 }
 0x25f   :  { %5729 = vst [vmem:[#allocation61_spill] sm:$0xff] %v5242_v52 }
 0x262   :  { %v5244_v41 = vpop.f32.mrf.mxu0 }
 0x263   :  { %v3739_v58 = vpop.f32.mrf.mxu1 }
 0x264   :  { %v5246_v23 = vpop.f32.mrf.mxu0 }
 0x265   :  { %v2186_v37 = vpop.f32.mrf.mxu1 }
 0x268   :  { %v5248_v25 = vpop.f32.mrf.mxu0 }
 0x269   :  { %5730 = vst [vmem:[#allocation65_spill] sm:$0xff] %v5248_v25  ;;  %v3742_v21 = vpop.f32.mrf.mxu1 }
 0x26a   :  { %v5250_v13 = vpop.f32.mrf.mxu0 }
 0x26b   :  { %5731 = vst [vmem:[#allocation67_spill] sm:$0xff] %v5250_v13  ;;  %v2202_v56 = vpop.f32.mrf.mxu1 }
 0x26e   :  { %v3683_v39 = vpop.f32.mrf.mxu0  ;;  %v5252_v43 = vpop.f32.mrf.mxu1 }
 0x26f   :  { %v2000_v52 = vadd.f32 %v3683_v39, %v1805_v10  ;;  %v1829_v10 = vadd.f32 %v5204_v31, %v5214_v57  ;;  %v1835_v31 = vadd.f32 %v5210_v49, %v5224_v19 }
 0x270   :  { %v1992_v38 = vpop.f32.mrf.mxu0  ;;  %v5254_v33 = vpop.f32.mrf.mxu1 }
 0x274   :  { %v3686_v34 = vpop.f32.mrf.mxu0  ;;  %v5256_v61 = vpop.f32.mrf.mxu1 }
 0x276   :  { %v2006_v59 = vpop.f32.mrf.mxu0  ;;  %v5258_v18 = vpop.f32.mrf.mxu1 }
 0x27a   :  { %v3689_v8 = vpop.f32.mrf.mxu0  ;;  %v5260_v48 = vpop.f32.mrf.mxu1 }
 0x27c   :  { %v2020_v5 = vpop.f32.mrf.mxu0  ;;  %v5262_v35 = vpop.f32.mrf.mxu1 }
 0x27d   :  { %5732 = vst [vmem:[#allocation70_spill] sm:$0xff] %v5262_v35 }
 0x280   :  { %v3692_v60 = vpop.f32.mrf.mxu0  ;;  %v5264_v22 = vpop.f32.mrf.mxu1 }
 0x281   :  { %5733 = vst [vmem:[#allocation72_spill] sm:$0xff] %v5264_v22  ;;  %v1811_v22 = vadd.f32 %v5202_v7, %v1517_v32  ;;  %v1841_v7 = vadd.f32 %v5208_v6, %v5220_v26  ;;  %v2028_v32 = vadd.f32 %v3689_v8, %v1829_v10  ;;  %v1853_v6 = vadd.f32 %v5212_v28, %v5228_v29 }
 0x282   :  { %v2034_v54 = vpop.f32.mrf.mxu0  ;;  %v5266_v46 = vpop.f32.mrf.mxu1 }
 0x283   :  { %5734 = vst [vmem:[#allocation73_spill] sm:$0xff] %v5266_v46  ;;  %v1799_v46 = vadd.f32 %v5198_v14, %v1497_v44  ;;  %v2007_v45 = vadd.f32 %v2006_v59, %v1811_v22  ;;  %v1823_v14 = vadd.f32 %v5206_v15, %v5218_v55  ;;  %v2042_v15 = vadd.f32 %v3692_v60, %v1841_v7 }
 0x284   :  { %v2035_v26 = vadd.f32 %v2034_v54, %v1835_v31  ;;  %v2227_v8 = vadd.f32 %v5252_v43, %v2028_v32  ;;  %v1847_v60 = vadd.f32 %v5216_v40, %v5232_v36 }
 0x285   :  { %v1993_v17 = vadd.f32 %v1992_v38, %v1799_v46  ;;  %v2203_v22 = vadd.f32 %v2202_v56, %v2007_v45  ;;  %v2243_v28 = vadd.f32 %v5256_v61, %v2042_v15  ;;  %v1859_v61 = vadd.f32 %v5226_v9, %v5240_v62  ;;  %v5743_v9 = vld [vmem:[#allocation70_spill] sm:$0xff] }
 0x286   :  { %v5268_v42 = vpop.f32.mrf.mxu0  ;;  %v5270_v63 = vpop.f32.mrf.mxu1  ;;  %v2235_v40 = vadd.f32 %v5258_v18, %v2035_v26  ;;  %v1877_v18 = vadd.f32 %v5230_v51, %v5244_v41 }
 0x287   :  { %5735 = vst [vmem:[#allocation74_spill] sm:$0xff] %v5270_v63  ;;  %v2187_v47 = vadd.f32 %v2186_v37, %v1993_v17 }
 0x288   :  { %v5272_v50 = vpop.f32.mrf.mxu0  ;;  %v5274_v4 = vpop.f32.mrf.mxu1  ;;  %v5746_v15 = vld [vmem:[#allocation72_spill] sm:$0xff] }
 0x289   :  { %5736 = vst [vmem:[#allocation75_spill] sm:$0xff] %v5274_v4  ;;  %v2049_v45 = vadd.f32 %v5272_v50, %v1847_v60 }
 0x28b   :  { %v2251_v62 = vadd.f32 %v5743_v9, %v2049_v45  ;;  %v3926_v45 = vld [vmem:[#allocation2 + $0x8] sm:$0xff]  ;;  %v3928_v9 = vld [vmem:[#allocation2 + $0x18] sm:$0xff] }
 0x28c   :  { %v5276_v16 = vpop.f32.mrf.mxu0  ;;  %v5278_v1 = vpop.f32.mrf.mxu1 }
 0x28d   :  { %5737 = vst [vmem:[#allocation62_spill] sm:$0xff] %v5278_v1  ;;  %v1817_v1 = vadd.f32 %v5200_v24, %v3574_v11 }
 0x28e   :  { %v5280_v53 = vpop.f32.mrf.mxu0  ;;  %v5282_v0 = vpop.f32.mrf.mxu1 }
 0x28f   :  { %5738 = vst [vmem:[#allocation33_spill] sm:$0xff] %v5280_v53  ;;  %5739 = vst [vmem:[#allocation34_spill] sm:$0xff] %v5282_v0  ;;  %v2195_v53 = vadd.f32 %v3739_v58, %v2000_v52  ;;  %v2021_v52 = vadd.f32 %v2020_v5, %v1823_v14 }
 0x291   :  { %v2219_v56 = vadd.f32 %v5254_v33, %v2021_v52  ;;  %v1865_v33 = vadd.f32 %v5222_v30, %v5236_v2 }
 0x292   :  { %v5284_v3 = vpop.f32.mrf.mxu0 }
 0x293   :  { %5740 = vst [vmem:[#allocation38_spill] sm:$0xff] %v5284_v3  ;;  %v3851_v20 = vpop.f32.mrf.mxu1  ;;  %v2014_v3 = vadd.f32 %v3686_v34, %v1817_v1 }
 0x294   :  { %v5286_v12 = vpop.f32.mrf.mxu0 }
 0x295   :  { %5741 = vst [vmem:[#allocation42_spill] sm:$0xff] %v5286_v12  ;;  %v2602_v63 = vpop.f32.mrf.mxu1  ;;  %v2211_v38 = vadd.f32 %v3742_v21, %v2014_v3 }
 0x297   :  { %v5290_v4 = vpop.f32.mrf.mxu0 }
 0x298   :  { %v3854_v13 = vpop.f32.mrf.mxu1 }
 0x299   :  { %v5293_v25 = vpop.f32.mrf.mxu0 }
 0x29a   :  { %v2614_v0 = vpop.f32.mrf.mxu1 }
 0x29c   :  { %v3795_v12 = vpop.f32.mrf.mxu0  ;;  %v3857_v35 = vpop.f32.mrf.mxu1 }
 0x29d   :  { %v2432_v27 = vadd.f32 %v3795_v12, %v2195_v53 }
 0x29e   :  { %v2425_v24 = vpop.f32.mrf.mxu0  ;;  %v2626_v44 = vpop.f32.mrf.mxu1 }
 0x29f   :  { %v2609_v11 = vadd.f32 %v3851_v20, %v2432_v27  ;;  %v2426_v39 = vadd.f32 %v2425_v24, %v2187_v47  ;;  %v2070_v24 = vadd.f32 %v5276_v16, %v1865_v33 }
 0x2a0   :  { %v3798_v58 = vpop.f32.mrf.mxu0  ;;  %v3860_v34 = vpop.f32.mrf.mxu1 }
 0x2a1   :  { %v2697_v59 = vmul.f32 0.03125, %v2609_v11  ;;  %v2603_v17 = vadd.f32 %v2602_v63, %v2426_v39  ;;  %v2444_v37 = vadd.f32 %v3798_v58, %v2211_v38  ;;  %v5742_v38 = vld [vmem:[#allocation52_spill] sm:$0xff]  ;;  %v2275_v51 = vadd.f32 %v5746_v15, %v2070_v24  ;;  %v3929_v15 = vld [vmem:[#allocation2 + $0x10] sm:$0xff] }
 0x2a2   :  { %v2437_v57 = vpop.f32.mrf.mxu0  ;;  %v2638_v55 = vpop.f32.mrf.mxu1 }
 0x2a3   :  { %v2713_v46 = vadd.f32 1e-05, %v2697_v59  ;;  %v2696_v47 = vmul.f32 0.03125, %v2603_v17  ;;  %v2621_v21 = vadd.f32 %v3854_v13, %v2444_v37  ;;  %v2438_v1 = vadd.f32 %v2437_v57, %v2203_v22  ;;  %v5745_v22 = vld [vmem:[#allocation38_spill] sm:$0xff] }
 0x2a4   :  { %v3801_v5 = vpop.f32.mrf.mxu0  ;;  %v3863_v63 = vpop.f32.mrf.mxu1  ;;  %v2056_v13 = vadd.f32 %v5268_v42, %v1853_v6  ;;  %v5750_v6 = vld [vmem:[#allocation61_spill] sm:$0xff] }
 0x2a5   :  { %3878 = vrsqrt.f32 %v2713_v46  ;;  %v2712_v53 = vadd.f32 1e-05, %v2696_v47  ;;  %v2699_v49 = vmul.f32 0.03125, %v2621_v21  ;;  %v2615_v19 = vadd.f32 %v2614_v0, %v2438_v1  ;;  %v5747_v46 = vld [vmem:[#allocation65_spill] sm:$0xff]  ;;  %v5749_v1 = vld [vmem:[#allocation67_spill] sm:$0xff] }
 0x2a6   :  { %v2456_v3 = vadd.f32 %v3801_v5, %v2227_v8  ;;  %v2449_v20 = vpop.f32.mrf.mxu0  ;;  %v2650_v12 = vpop.f32.mrf.mxu1  ;;  %v2259_v30 = vadd.f32 %v5260_v48, %v2056_v13  ;;  %v5744_v48 = vld [vmem:[#allocation33_spill] sm:$0xff]  ;;  %v1883_v26 = vadd.f32 %v5750_v6, %v5749_v1 }
 0x2a7   :  { %3880 = vrsqrt.f32 %v2712_v53  ;;  %v2715_v29 = vadd.f32 1e-05, %v2699_v49  ;;  %v2698_v43 = vmul.f32 0.03125, %v2615_v19  ;;  %v2450_v54 = vadd.f32 %v2449_v20, %v2219_v56  ;;  %v5748_v47 = vld [vmem:[#allocation57_spill] sm:$0xff] }
 0x2a8   :  { %v2633_v0 = vadd.f32 %v3857_v35, %v2456_v3  ;;  %v3804_v27 = vpop.f32.mrf.mxu0  ;;  %v3866_v10 = vpop.f32.mrf.mxu1  ;;  %v2063_v37 = vadd.f32 %v5744_v48, %v1859_v61  ;;  %v1889_v21 = vadd.f32 %v5748_v47, %v5747_v46 }
 0x2a9   :  { %3882 = vrsqrt.f32 %v2715_v29  ;;  %v2714_v36 = vadd.f32 1e-05, %v2698_v43  ;;  %v2627_v42 = vadd.f32 %v2626_v44, %v2450_v54  ;;  %v2468_v14 = vadd.f32 %v3804_v27, %v2243_v28  ;;  %v5752_v28 = vld [vmem:[#allocation73_spill] sm:$0xff]  ;;  %v5753_v54 = vld [vmem:[#allocation74_spill] sm:$0xff] }
 0x2aa   :  { %v2701_v11 = vmul.f32 0.03125, %v2633_v0  ;;  %v2461_v39 = vpop.f32.mrf.mxu0  ;;  %v1871_v44 = vadd.f32 %v5742_v38, %v5246_v23  ;;  %v2662_v32 = vpop.f32.mrf.mxu1  ;;  %v2098_v3 = vadd.f32 %v5290_v4, %v1889_v21  ;;  %v2267_v29 = vadd.f32 %v5752_v28, %v2063_v37 }
 0x2ab   :  { %3884 = vrsqrt.f32 %v2714_v36  ;;  %v2700_v2 = vmul.f32 0.03125, %v2627_v42  ;;  %v2645_v35 = vadd.f32 %v3860_v34, %v2468_v14  ;;  %v2462_v50 = vadd.f32 %v2461_v39, %v2235_v40 }
 0x2ac   :  { %v2717_v7 = vadd.f32 1e-05, %v2701_v11  ;;  %v3807_v52 = vpop.f32.mrf.mxu0  ;;  %v2084_v34 = vadd.f32 %v5745_v22, %v1877_v18  ;;  %v3869_v5 = vpop.f32.mrf.mxu1  ;;  %v2091_v42 = vadd.f32 %v5293_v25, %v1883_v26  ;;  %v5754_v11 = vld [vmem:[#allocation75_spill] sm:$0xff] }
 0x2ad   :  { %v2716_v16 = vadd.f32 1e-05, %v2700_v2  ;;  %v2703_v58 = vmul.f32 0.03125, %v2645_v35  ;;  %v2639_v59 = vadd.f32 %v2638_v55, %v2462_v50  ;;  %v2480_v17 = vadd.f32 %v3807_v52, %v2259_v30  ;;  %v5751_v55 = vld [vmem:[#allocation42_spill] sm:$0xff]  ;;  %v3927_v30 = vld [vmem:[#allocation2] sm:$0xff] }
 0x2ae   :  { %3886 = vrsqrt.f32 %v2717_v7  ;;  %v2473_v31 = vpop.f32.mrf.mxu0  ;;  %v2077_v8 = vadd.f32 %v5751_v55, %v1871_v44  ;;  %v2291_v33 = vadd.f32 %v5753_v54, %v2084_v34  ;;  %v2674_v14 = vpop.f32.mrf.mxu1  ;;  %v5755_v7 = vld [vmem:[#allocation62_spill] sm:$0xff] }
 0x2af   :  { %3888 = vrsqrt.f32 %v2716_v16  ;;  %v2719_v41 = vadd.f32 1e-05, %v2703_v58  ;;  %v2702_v23 = vmul.f32 0.03125, %v2639_v59  ;;  %v2657_v57 = vadd.f32 %v3863_v63, %v2480_v17  ;;  %v5337_v63 = vld [vmem:[%s5369_s1] ss:$0 sm:$0xff]  ;;  %v5756_v34 = vld [vmem:[#allocation34_spill] sm:$0xff] }
 0x2b0   :  { %v2474_v56 = vadd.f32 %v2473_v31, %v2251_v62  ;;  %v3810_v53 = vpop.f32.mrf.mxu0  ;;  %v2283_v39 = vadd.f32 %v5754_v11, %v2077_v8  ;;  %v2307_v52 = vadd.f32 %v5755_v7, %v2098_v3  ;;  %v3872_v17 = vpop.f32.mrf.mxu1  ;;  %v2299_v31 = vadd.f32 %v5756_v34, %v2091_v42  ;;  %v3930_v8 = vld [vmem:[#allocation2 + $0x28] sm:$0xff]  ;;  %v3932_v54 = vld [vmem:[#allocation2 + $0x38] sm:$0xff]  ;;  %v3937_v7 = vld [vmem:[#allocation2 + $0x50] sm:$0xff]  ;;  %s4011_s1 = smov [#allocation7]  }
 0x2b1   :  { %3890 = vrsqrt.f32 %v2719_v41  ;;  %v2718_v49 = vadd.f32 1e-05, %v2702_v23  ;;  %v2705_v19 = vmul.f32 0.03125, %v2657_v57  ;;  %v2492_v60 = vadd.f32 %v3810_v53, %v2275_v51  ;;  %s2803_s24 = sshll.u32 %s4011_s1, 4  ;;  %s2804_s24 = int_to_ptr.vmem [resolvable:$true] %s2803_s24 }
 0x2b2   :  { %v3879_v13 = vpop.eup %3878  ;;  %v2651_v20 = vadd.f32 %v2650_v12, %v2474_v56  ;;  %v2485_v43 = vpop.f32.mrf.mxu0  ;;  %s3981_s25 = scalar_lea.vmem %s2804_s24, 2048  ;;  %p3986_p11 = scmp.lt.s32.totalorder %s2804_s24, %s2804_s24 }
 0x2b3   :  { %v2745_v0 = vmul.f32 %v3926_v45, %v3879_v13  ;;  %3892 = vrsqrt.f32 %v2718_v49  ;;  %v2721_v27 = vadd.f32 1e-05, %v2705_v19  ;;  %v2669_v40 = vadd.f32 %v3866_v10, %v2492_v60  ;;  %v2686_v56 = vpop.f32.mrf.mxu1  ;;  %v3931_v19 = vld [vmem:[#allocation2 + $0x20] sm:$0xff]  ;;  %p3982_p10 = scmp.ne.s32.totalorder %s2804_s24, %s3981_s25  ;;  %p3987_p12 = scmp.lt.s32.totalorder %s3981_s25, %s3981_s25 }
 0x2b4   :  { %v3881_v36 = vpop.eup %3880  ;;  %v2704_v4 = vmul.f32 0.03125, %v2651_v20  ;;  %v2486_v61 = vadd.f32 %v2485_v43, %v2267_v29  ;;  %v3813_v24 = vpop.f32.mrf.mxu0 }
 0x2b5   :  { %v2767_v12 = vmul.f32 %v5337_v63, %v2745_v0  ;;  %v2744_v2 = vmul.f32 %v3927_v30, %v3881_v36  ;;  %3894 = vrsqrt.f32 %v2721_v27  ;;  %v2707_v35 = vmul.f32 0.03125, %v2669_v40  ;;  %v3933_v36 = vld [vmem:[#allocation2 + $0x30] sm:$0xff]  ;;  %p3988_p13 = por %p3987_p12, %p3986_p11 }
 0x2b6   :  { %v3883_v50 = vpop.eup %3882  ;;  %v2720_v18 = vadd.f32 1e-05, %v2704_v4  ;;  %v2663_v38 = vadd.f32 %v2662_v32, %v2486_v61  ;;  %v2504_v44 = vadd.f32 %v3813_v24, %v2291_v33  ;;  %v2497_v10 = vpop.f32.mrf.mxu0  ;;  %v3934_v24 = vld [vmem:[#allocation2 + $0x48] sm:$0xff] }
 0x2b7   :  { %2783 = vst [vmem:[#allocation7 + $0x8] sm:$0xff] %v2767_v12  ;;  %v2766_v25 = vmul.f32 %v5337_v63, %v2744_v2  ;;  %v2747_v62 = vmul.f32 %v3928_v9, %v3883_v50  ;;  %v2723_v16 = vadd.f32 1e-05, %v2707_v35  ;;  %v2498_v58 = vadd.f32 %v2497_v10, %v2283_v39  ;;  %v3935_v2 = vld [vmem:[#allocation2 + $0x40] sm:$0xff]  ;;  %v3936_v50 = vld [vmem:[#allocation2 + $0x58] sm:$0xff]  ;;  %p3989_p0 = pnand %p3988_p13, %p3982_p10 }
 0x2b8   :  { %v3885_v59 = vpop.eup %3884  ;;  %3896 = vrsqrt.f32 %v2720_v18  ;;  %v2706_v48 = vmul.f32 0.03125, %v2663_v38  ;;  %v2681_v37 = vadd.f32 %v3869_v5, %v2504_v44  ;;  %v3816_v22 = vpop.f32.mrf.mxu0 }
 0x2b9   :  { %2782 = vst [vmem:[#allocation7] sm:$0xff] %v2766_v25  ;;  %v2769_v32 = vmul.f32 %v5337_v63, %v2747_v62  ;;  %v2746_v51 = vmul.f32 %v3929_v15, %v3885_v59  ;;  %3898 = vrsqrt.f32 %v2723_v16  ;;  %v2675_v41 = vadd.f32 %v2674_v14, %v2498_v58  ;;  %v3938_v16 = vld [vmem:[#allocation2 + $0x68] sm:$0xff]  ;;  %v3939_v59 = vld [vmem:[#allocation2 + $0x60] sm:$0xff]  ;;  %v3940_v15 = vld [vmem:[#allocation2 + $0x70] sm:$0xff] }
 0x2ba   :  { %v2722_v23 = vadd.f32 1e-05, %v2706_v48  ;;  %v2709_v57 = vmul.f32 0.03125, %v2681_v37  ;;  %v2516_v46 = vadd.f32 %v3816_v22, %v2307_v52  ;;  %v2509_v47 = vpop.f32.mrf.mxu0 }
 0x2bb   :  { %v3887_v21 = vpop.eup %3886  ;;  %2785 = vst [vmem:[#allocation7 + $0x18] sm:$0xff] %v2769_v32  ;;  %v2768_v1 = vmul.f32 %v5337_v63, %v2746_v51  ;;  %v2708_v6 = vmul.f32 0.03125, %v2675_v41  ;;  %v2510_v26 = vadd.f32 %v2509_v47, %v2299_v31  ;;  %v5757_v31 = vld [vmem:[#allocation49_spill] sm:$0xff] }
 0x2bc   :  { %v3889_v55 = vpop.eup %3888  ;;  %v2749_v5 = vmul.f32 %v3930_v8, %v3887_v21  ;;  %3900 = vrsqrt.f32 %v2722_v23  ;;  %v2725_v53 = vadd.f32 1e-05, %v2709_v57  ;;  %v2693_v49 = vadd.f32 %v3872_v17, %v2516_v46 }
 0x2bd   :  { %2784 = vst [vmem:[#allocation7 + $0x10] sm:$0xff] %v2768_v1  ;;  %v2748_v60 = vmul.f32 %v3931_v19, %v3889_v55  ;;  %v2724_v13 = vadd.f32 1e-05, %v2708_v6  ;;  %v2687_v3 = vadd.f32 %v2686_v56, %v2510_v26 }
 0x2be   :  { %v3891_v20 = vpop.eup %3890  ;;  %v2771_v28 = vmul.f32 %v5337_v63, %v2749_v5  ;;  %3902 = vrsqrt.f32 %v2725_v53  ;;  %v2711_v29 = vmul.f32 0.03125, %v2693_v49 }
 0x2bf   :  { %v2770_v43 = vmul.f32 %v5337_v63, %v2748_v60  ;;  %v2751_v33 = vmul.f32 %v3932_v54, %v3891_v20  ;;  %3904 = vrsqrt.f32 %v2724_v13  ;;  %v2710_v45 = vmul.f32 0.03125, %v2687_v3 }
 0x2c0   :  { %v3893_v0 = vpop.eup %3892  ;;  %2787 = vst [vmem:[#allocation7 + $0x28] sm:$0xff] %v2771_v28  ;;  %v2727_v27 = vadd.f32 1e-05, %v2711_v29 }
 0x2c1   :  { %2786 = vst [vmem:[#allocation7 + $0x20] sm:$0xff] %v2770_v43  ;;  %v2773_v40 = vmul.f32 %v5337_v63, %v2751_v33  ;;  %v2750_v42 = vmul.f32 %v3933_v36, %v3893_v0  ;;  %v2726_v4 = vadd.f32 1e-05, %v2710_v45 }
 0x2c2   :  { %v3895_v14 = vpop.eup %3894  ;;  %3906 = vrsqrt.f32 %v2727_v27 }
 0x2c3   :  { %2789 = vst [vmem:[#allocation7 + $0x38] sm:$0xff] %v2773_v40  ;;  %v2772_v61 = vmul.f32 %v5337_v63, %v2750_v42  ;;  %v2753_v11 = vmul.f32 %v3934_v24, %v3895_v14  ;;  %3908 = vrsqrt.f32 %v2726_v4 }
 0x2c5   :  { %v3897_v39 = vpop.eup %3896  ;;  %2788 = vst [vmem:[#allocation7 + $0x30] sm:$0xff] %v2772_v61  ;;  %v2775_v12 = vmul.f32 %v5337_v63, %v2753_v11 }
 0x2c6   :  { %v3899_v30 = vpop.eup %3898  ;;  %v2752_v35 = vmul.f32 %v3935_v2, %v3897_v39 }
 0x2c7   :  { %2791 = vst [vmem:[#allocation7 + $0x48] sm:$0xff] %v2775_v12  ;;  %v2755_v18 = vmul.f32 %v3936_v50, %v3899_v30 }
 0x2c8   :  { %v2774_v38 = vmul.f32 %v5337_v63, %v2752_v35 }
 0x2c9   :  { %v3901_v44 = vpop.eup %3900  ;;  %v2777_v10 = vmul.f32 %v5337_v63, %v2755_v18 }
 0x2ca   :  { %2790 = vst [vmem:[#allocation7 + $0x40] sm:$0xff] %v2774_v38  ;;  %v2754_v52 = vmul.f32 %v3937_v7, %v3901_v44 }
 0x2cb   :  { %v3903_v25 = vpop.eup %3902  ;;  %2793 = vst [vmem:[#allocation7 + $0x58] sm:$0xff] %v2777_v10 }
 0x2cc   :  { %v3905_v9 = vpop.eup %3904  ;;  %v2776_v62 = vmul.f32 %v5337_v63, %v2754_v52  ;;  %v2757_v58 = vmul.f32 %v3938_v16, %v3903_v25 }
 0x2cd   :  { %v2756_v17 = vmul.f32 %v3939_v59, %v3905_v9 }
 0x2ce   :  { %2792 = vst [vmem:[#allocation7 + $0x50] sm:$0xff] %v2776_v62  ;;  %v2779_v48 = vmul.f32 %v5337_v63, %v2757_v58 }
 0x2cf   :  { %v3907_v37 = vpop.eup %3906  ;;  %v2778_v22 = vmul.f32 %v5337_v63, %v2756_v17 }
 0x2d0   :  { %v3909_v34 = vpop.eup %3908  ;;  %2795 = vst [vmem:[#allocation7 + $0x68] sm:$0xff] %v2779_v48  ;;  %v2759_v32 = vmul.f32 %v5757_v31, %v3907_v37 }
 0x2d1   :  { %2794 = vst [vmem:[#allocation7 + $0x60] sm:$0xff] %v2778_v22  ;;  %v2758_v51 = vmul.f32 %v3940_v15, %v3909_v34 }
 0x2d2   :  { %v2781_v41 = vmul.f32 %v5337_v63, %v2759_v32 }
 0x2d3   :  { %v2780_v23 = vmul.f32 %v5337_v63, %v2758_v51 }
 0x2d4   :  { %2797 = vst [vmem:[#allocation7 + $0x78] sm:$0xff] %v2781_v41 }
 0x2d5   :  { %2796 = vst [vmem:[#allocation7 + $0x70] sm:$0xff] %v2780_v23 }
 0x2d6   :  { %3992 = shalt.err (!%p3989_p0)
}
 0x2d7   :  { %2809 = dma.vmem_to_hbm [thread:$0]  %s2804_s24, 2048, %s5371_s3, [#allocation4], %s4008_s15, %s4008_s15, %s4009_s16  }
 0x2d8   :  { %4005 = dma.done.wait [#allocation4], 2048  }
 0x2d9   :  { %4006 = vsyncadd [#allocation4], 4294965248 }
 0x2da   :  { %2813 = vsyncpa [#allocation3], 1 }
 0x2db   :  { %2814 = vsyncpa [#allocation6], 1 }
 0x2dc   :  { %2815 = vsyncpa [#allocation4], 1 }

</bundles_post_ra>
